<compile_context>
chip_gen: v7x
topology: tpu7x:2x2x1
jax: 0.10.0
libtpu: 0.0.40
codegen_flags: <defaults>
</compile_context>

<pallas_src>
import math

import jax
import jax.numpy as jnp
from jax.experimental import pallas as pl
from jax.experimental.pallas import tpu as pltpu

# ----------------------------- model dims -----------------------------------
BATCH = 2
SEQ = 8
HIDDEN = 32
NUM_HEADS = 4
HEAD_DIM = HIDDEN // NUM_HEADS
INTERMEDIATE = 64
RMS_EPS = 1e-6
ROWS = BATCH * SEQ  # flattened (batch, seq) rows processed per kernel step


# ----------------------------- Pallas kernel ---------------------------------
def _rmsnorm(x, w, eps):
    var = jnp.mean(x * x, axis=-1, keepdims=True)
    return x * jax.lax.rsqrt(var + eps) * w


def bitformer_layer_kernel(
    x_ref,       # [ROWS, H]       f32   (batch*seq flattened; read at layer 0)
    bias_ref,    # [ROWS, ROWS]    f32   additive causal+block-diag mask bias
    ln1_w_ref,   # [H]             f32   (layer slice, squeezed)
    wqkv_ref,    # [H, 3H]         bf16  (Wq*1/sqrt(d) | Wk | Wv fused)
    wo_ref,      # [H, H]          bf16  flat output projection
    ln2_w_ref,   # [H]             f32
    wgu_ref,     # [H, 2I]         bf16  (Wgate | Wup fused, 128 lanes)
    wd_ref,      # [I, H]          bf16
    out_ref,     # [ROWS, H]       f32
    h_ref,       # [ROWS, H]       f32   VMEM scratch: activation carried across layers
):
    l = pl.program_id(0)

    @pl.when(l == 0)
    def _():
        h_ref[...] = x_ref[...]

    x = h_ref[...]                                         # f32 [ROWS, H]

    # ---- input RMSNorm (f32) ----
    xn = _rmsnorm(x, ln1_w_ref[...], RMS_EPS)

    # ---- fused QKV projection: single lane-dense MXU matmul ----
    qkv = jnp.dot(xn.astype(jnp.bfloat16), wqkv_ref[...],
                  preferred_element_type=jnp.float32)      # [ROWS, 3H] f32

    # ---- head split: one reshape + one transpose, then leading-axis slices --
    qkv_h = jnp.transpose(
        qkv.reshape(ROWS, 3 * NUM_HEADS, HEAD_DIM), (1, 0, 2))  # [3NH, ROWS, HD]
    qh = qkv_h[:NUM_HEADS].astype(jnp.bfloat16)            # [NH, ROWS, HD]
    kh = qkv_h[NUM_HEADS:2 * NUM_HEADS].astype(jnp.bfloat16)
    vh = qkv_h[2 * NUM_HEADS:].astype(jnp.bfloat16)

    # ---- attention, batched over heads; 1/sqrt(d) folded into Wq -----------
    s = jnp.einsum("nqd,nkd->nqk", qh, kh,
                   preferred_element_type=jnp.float32)     # [NH, ROWS, ROWS]
    s = s + bias_ref[...]                                  # causal + same-batch mask
    s = s - jnp.max(s, axis=-1, keepdims=True)
    p = jnp.exp(s)
    p = p * pl.reciprocal(jnp.sum(p, axis=-1, keepdims=True), approx=True)

    o = jnp.einsum("nqk,nkd->nqd", p.astype(jnp.bfloat16), vh,
                   preferred_element_type=jnp.float32)     # [NH, ROWS, HD] f32

    # ---- merge heads + output projection as ONE flat MXU matmul ------------
    o_flat = jnp.transpose(o, (1, 0, 2)).reshape(ROWS, HIDDEN)
    attn = jnp.dot(o_flat.astype(jnp.bfloat16), wo_ref[...],
                   preferred_element_type=jnp.float32)     # [ROWS, H] f32

    # ---- first residual ----
    h1 = x + attn

    # ---- post-attention RMSNorm (f32) ----
    h1n = _rmsnorm(h1, ln2_w_ref[...], RMS_EPS)

    # ---- fused gated (SiLU) MLP: gate|up in one 128-lane-dense matmul ------
    gu = jnp.dot(h1n.astype(jnp.bfloat16), wgu_ref[...],
                 preferred_element_type=jnp.float32)       # [ROWS, 2I] f32
    g = gu[:, :INTERMEDIATE]
    u = gu[:, INTERMEDIATE:]
    act = (g * jax.nn.sigmoid(g)) * u                      # SiLU(g) * up, f32
    mlp = jnp.dot(act.astype(jnp.bfloat16), wd_ref[...],
                  preferred_element_type=jnp.float32)      # [ROWS, H] f32

    # ---- second residual: carry to next layer + write output ---------------
    h_new = h1 + mlp
    h_ref[...] = h_new
    out_ref[...] = h_new


# ----------------------------- wrapper ---------------------------------------
def prepare_kernel_params(layer_params):
    """Layout-only transforms done once (fuse, scale-fold, cast, stack layers)."""
    inv = 1.0 / math.sqrt(HEAD_DIM)

    def stack(fn):
        return jnp.stack([fn(p) for p in layer_params], axis=0)

    return {
        "ln1_w": stack(lambda p: p["ln1_w"].astype(jnp.float32)),          # [L, H]
        "wqkv": stack(lambda p: jnp.concatenate(
            [p["wq"] * inv, p["wk"], p["wv"]], axis=1)
            .astype(jnp.bfloat16)),                                        # [L, H, 3H]
        "wo": stack(lambda p: p["wo"].astype(jnp.bfloat16)),               # [L, H, H]
        "ln2_w": stack(lambda p: p["ln2_w"].astype(jnp.float32)),          # [L, H]
        "wgu": stack(lambda p: jnp.concatenate([p["wg"], p["wu"]], axis=1)
                     .astype(jnp.bfloat16)),                               # [L, H, 2I]
        "wd": stack(lambda p: p["wd"].astype(jnp.bfloat16)),               # [L, I, H]
    }


def make_attention_bias(batch, seq):
    """Additive causal + block-diagonal (same-batch) mask bias, built once."""
    rows = batch * seq
    r = jnp.arange(rows)
    row = r[:, None]
    col = r[None, :]
    valid = (col <= row) & ((col // seq) == (row // seq))
    return jnp.where(valid, 0.0, -1e30).astype(jnp.float32)


@jax.jit
def bitformer_forward(x, attn_bias, kp):
    """Run L stacked BitformerLayers (L = leading dim of the weight stack)."""
    B, S, H = x.shape
    rows = B * S
    L = kp["wqkv"].shape[0]
    x2 = x.reshape(rows, H)         # wrapper-side layout plumbing (free)

    sq = pl.Squeezed()
    grid_spec = pltpu.PrefetchScalarGridSpec(
        num_scalar_prefetch=0,
        grid=(L,),                  # layer axis: weight DMA pipelines behind compute
        in_specs=[
            pl.BlockSpec((rows, H), lambda l: (0, 0)),                 # activations
            pl.BlockSpec((rows, rows), lambda l: (0, 0)),              # mask bias
            pl.BlockSpec((sq, H), lambda l: (l, 0)),                   # ln1 weight
            pl.BlockSpec((sq, H, 3 * H), lambda l: (l, 0, 0)),         # fused Wq|Wk|Wv
            pl.BlockSpec((sq, H, H), lambda l: (l, 0, 0)),             # Wo (flat)
            pl.BlockSpec((sq, H), lambda l: (l, 0)),                   # ln2 weight
            pl.BlockSpec((sq, H, 2 * INTERMEDIATE), lambda l: (l, 0, 0)),  # Wgate|Wup
            pl.BlockSpec((sq, INTERMEDIATE, H), lambda l: (l, 0, 0)),  # Wdown
        ],
        out_specs=pl.BlockSpec((rows, H), lambda l: (0, 0)),
        scratch_shapes=[pltpu.VMEM((rows, H), jnp.float32)],           # layer carry
    )

    out2 = pl.pallas_call(
        bitformer_layer_kernel,
        out_shape=jax.ShapeDtypeStruct((rows, H), jnp.float32),
        grid_spec=grid_spec,
        compiler_params=pltpu.CompilerParams(
            dimension_semantics=("arbitrary",)),
    )(x2, attn_bias, kp["ln1_w"], kp["wqkv"], kp["wo"],
      kp["ln2_w"], kp["wgu"], kp["wd"])

    return out2.reshape(B, S, H)


# ----------------------------- pure-JAX reference ----------------------------
def bitformer_layer_ref(x, p):
    def rms(v, w):
        return v * jax.lax.rsqrt(jnp.mean(v * v, -1, keepdims=True) + RMS_EPS) * w

    xn = rms(x, p["ln1_w"])
    q = xn @ p["wq"]
    k = xn @ p["wk"]
    v = xn @ p["wv"]
    B, S, H = x.shape
    q = q.reshape(B, S, NUM_HEADS, HEAD_DIM).transpose(0, 2, 1, 3)
    k = k.reshape(B, S, NUM_HEADS, HEAD_DIM).transpose(0, 2, 1, 3)
    v = v.reshape(B, S, NUM_HEADS, HEAD_DIM).transpose(0, 2, 1, 3)
    s = jnp.einsum("bhqd,bhkd->bhqk", q, k) / math.sqrt(HEAD_DIM)
    mask = jnp.tril(jnp.ones((S, S), bool))
    s = jnp.where(mask, s, -1e30)
    pattn = jax.nn.softmax(s, axis=-1)
    o = jnp.einsum("bhqk,bhkd->bhqd", pattn, v).transpose(0, 2, 1, 3).reshape(B, S, H)
    attn = o @ p["wo"]
    h1 = x + attn
    h1n = rms(h1, p["ln2_w"])
    g = h1n @ p["wg"]
    u = h1n @ p["wu"]
    mlp = (jax.nn.silu(g) * u) @ p["wd"]
    return h1 + mlp


# ----------------------------- main ------------------------------------------
def init_params(key):
    ks = jax.random.split(key, 8)
    sc = 0.02
    return {
        "ln1_w": jnp.ones((HIDDEN,), jnp.float32),
        "wq": sc * jax.random.normal(ks[0], (HIDDEN, HIDDEN), jnp.float32),
        "wk": sc * jax.random.normal(ks[1], (HIDDEN, HIDDEN), jnp.float32),
        "wv": sc * jax.random.normal(ks[2], (HIDDEN, HIDDEN), jnp.float32),
        "wo": sc * jax.random.normal(ks[3], (HIDDEN, HIDDEN), jnp.float32),
        "ln2_w": jnp.ones((HIDDEN,), jnp.float32),
        "wg": sc * jax.random.normal(ks[4], (HIDDEN, INTERMEDIATE), jnp.float32),
        "wu": sc * jax.random.normal(ks[5], (HIDDEN, INTERMEDIATE), jnp.float32),
        "wd": sc * jax.random.normal(ks[6], (INTERMEDIATE, HIDDEN), jnp.float32),
    }


if __name__ == "__main__":
    key = jax.random.PRNGKey(0)
    kx, kp_key = jax.random.split(key)
    x = jax.random.normal(kx, (BATCH, SEQ, HIDDEN), jnp.float32)
    attn_bias = make_attention_bias(BATCH, SEQ)

    # --- single layer: matches the BitformerLayer module exactly (L=1) ------
    params = init_params(kp_key)
    kp1 = prepare_kernel_params([params])
    out = jax.block_until_ready(bitformer_forward(x, attn_bias, kp1))
    ref = bitformer_layer_ref(x, params)
    assert out.shape == (BATCH, SEQ, HIDDEN)
    # bf16 matmul operands (f32 accumulation) -> tolerance loosened accordingly.
    assert jnp.allclose(out, ref, atol=5e-3, rtol=5e-3), "single-layer mismatch"

    # --- stacked layers (L=3): validates the amortized grid=(L,) carry path --
    stack_keys = jax.random.split(kp_key, 3)
    params_stack = [init_params(k) for k in stack_keys]
    kp3 = prepare_kernel_params(params_stack)
    out3 = jax.block_until_ready(bitformer_forward(x, attn_bias, kp3))
    ref3 = x
    for p in params_stack:
        ref3 = bitformer_layer_ref(ref3, p)
    assert jnp.allclose(out3, ref3, atol=1e-2, rtol=1e-2), "stacked-layer mismatch"

    print("KERNEL_OK")
</pallas_src>

<mosaic_0001>
module attributes {stable_mosaic.version = 11 : i64} {
  func.func @bitformer_layer_kernel(%arg0: i32, %arg1: memref<16x32xf32, #tpu.memory_space<vmem>>, %arg2: memref<16x16xf32, #tpu.memory_space<vmem>>, %arg3: memref<1x32xf32, #tpu.memory_space<vmem>>, %arg4: memref<1x32x96xbf16, #tpu.memory_space<vmem>>, %arg5: memref<1x32x32xbf16, #tpu.memory_space<vmem>>, %arg6: memref<1x32xf32, #tpu.memory_space<vmem>>, %arg7: memref<1x32x128xbf16, #tpu.memory_space<vmem>>, %arg8: memref<1x64x32xbf16, #tpu.memory_space<vmem>>, %arg9: memref<16x32xf32, #tpu.memory_space<vmem>>, %arg10: memref<16x32xf32, #tpu.memory_space<vmem>>) attributes {dimension_semantics = [#tpu.dimension_semantics<arbitrary>], iteration_bounds = array<i64: 1>, scalar_prefetch = 0 : i64, scratch_operands = 1 : i64, tpu.core_type = #tpu.core_type<tc>, window_params = [{pipeline_mode = #tpu.pipeline_mode<synchronous>, transform_indices = @transform_0, window_bounds = array<i64: 16, 32>}, {pipeline_mode = #tpu.pipeline_mode<synchronous>, transform_indices = @transform_1, window_bounds = array<i64: 16, 16>}, {transform_indices = @transform_2, window_bounds = array<i64: 1, 32>}, {transform_indices = @transform_3, window_bounds = array<i64: 1, 32, 96>}, {transform_indices = @transform_4, window_bounds = array<i64: 1, 32, 32>}, {transform_indices = @transform_5, window_bounds = array<i64: 1, 32>}, {transform_indices = @transform_6, window_bounds = array<i64: 1, 32, 128>}, {transform_indices = @transform_7, window_bounds = array<i64: 1, 64, 32>}, {pipeline_mode = #tpu.pipeline_mode<synchronous>, transform_indices = @transform_8, window_bounds = array<i64: 16, 32>}]} {
    %c0_i32 = arith.constant 0 : i32
    %0 = arith.cmpi eq, %arg0, %c0_i32 : i32
    %1 = arith.extui %0 : i1 to i32
    %c0_i32_0 = arith.constant 0 : i32
    %2 = arith.cmpi ne, %1, %c0_i32_0 : i32
    scf.if %2 {
      %c0_38 = arith.constant 0 : index
      %c0_39 = arith.constant 0 : index
      %90 = vector.load %arg1[%c0_38, %c0_39] : memref<16x32xf32, #tpu.memory_space<vmem>>, vector<16x32xf32>
      %c0_40 = arith.constant 0 : index
      %c0_41 = arith.constant 0 : index
      %91 = vector.load %arg10[%c0_40, %c0_41] : memref<16x32xf32, #tpu.memory_space<vmem>>, vector<16x32xf32>
      tpu.vector_store %arg10[%c0_40, %c0_41], %90 {strides = array<i32>} : memref<16x32xf32, #tpu.memory_space<vmem>>, vector<16x32xf32>,
    } else {
    }
    %c0 = arith.constant 0 : index
    %c0_1 = arith.constant 0 : index
    %3 = vector.load %arg10[%c0, %c0_1] : memref<16x32xf32, #tpu.memory_space<vmem>>, vector<16x32xf32>
    %c0_2 = arith.constant 0 : index
    %c0_3 = arith.constant 0 : index
    %4 = vector.load %arg3[%c0_2, %c0_3] : memref<1x32xf32, #tpu.memory_space<vmem>>, vector<1x32xf32>
    %5 = vector.shape_cast %4 : vector<1x32xf32> to vector<32xf32>
    %6 = arith.mulf %3, %3 : vector<16x32xf32>
    %cst = arith.constant dense<0.000000e+00> : vector<16xf32>
    %7 = vector.multi_reduction <add>, %6, %cst [1] : vector<16x32xf32> to vector<16xf32>
    %8 = vector.shape_cast %7 : vector<16xf32> to vector<16x1xf32>
    %cst_4 = arith.constant 3.200000e+01 : f32
    %9 = vector.broadcast %cst_4 : f32 to vector<16x1xf32>
    %10 = arith.divf %8, %9 : vector<16x1xf32>
    %cst_5 = arith.constant 9.99999997E-7 : f32
    %11 = vector.broadcast %cst_5 : f32 to vector<16x1xf32>
    %12 = arith.addf %10, %11 : vector<16x1xf32>
    %13 = math.rsqrt %12 : vector<16x1xf32>
    %14 = vector.broadcast %13 : vector<16x1xf32> to vector<16x32xf32>
    %15 = arith.mulf %3, %14 : vector<16x32xf32>
    %16 = vector.shape_cast %5 : vector<32xf32> to vector<1x32xf32>
    %17 = vector.broadcast %16 : vector<1x32xf32> to vector<16x32xf32>
    %18 = arith.mulf %15, %17 : vector<16x32xf32>
    %19 = arith.truncf %18 : vector<16x32xf32> to vector<16x32xbf16>
    %c0_6 = arith.constant 0 : index
    %c0_7 = arith.constant 0 : index
    %c0_8 = arith.constant 0 : index
    %20 = vector.load %arg4[%c0_6, %c0_7, %c0_8] : memref<1x32x96xbf16, #tpu.memory_space<vmem>>, vector<1x32x96xbf16>
    %21 = vector.shape_cast %20 : vector<1x32x96xbf16> to vector<32x96xbf16>
    %cst_9 = arith.constant dense<0.000000e+00> : vector<16x96xf32>
    %22 = tpu.matmul %19, %21, %cst_9 {dimension_numbers = #tpu.dot_dimension_numbers<[1], [0], [0], [1], [0, 0, 1, 1], [], []>} : vector<16x32xbf16>, vector<32x96xbf16>, vector<16x96xf32> -> vector<16x96xf32>
    %23 = vector.shape_cast %22 : vector<16x96xf32> to vector<16x12x8xf32>
    %24 = tpu.transpose %23, [1, 0, 2] : vector<16x12x8xf32> -> vector<12x16x8xf32>
    %25 = vector.extract_strided_slice %24 {offsets = [0, 0, 0], sizes = [4, 16, 8], strides = [1, 1, 1]} : vector<12x16x8xf32> to vector<4x16x8xf32>
    %26 = arith.truncf %25 : vector<4x16x8xf32> to vector<4x16x8xbf16>
    %27 = vector.extract_strided_slice %24 {offsets = [4, 0, 0], sizes = [4, 16, 8], strides = [1, 1, 1]} : vector<12x16x8xf32> to vector<4x16x8xf32>
    %28 = arith.truncf %27 : vector<4x16x8xf32> to vector<4x16x8xbf16>
    %29 = vector.extract_strided_slice %24 {offsets = [8, 0, 0], sizes = [4, 16, 8], strides = [1, 1, 1]} : vector<12x16x8xf32> to vector<4x16x8xf32>
    %30 = arith.truncf %29 : vector<4x16x8xf32> to vector<4x16x8xbf16>
    "tpu.trace_start"() <{level = 10 : i32, message = "nqd,nkd->nqk"}> : () -> ()
    %cst_10 = arith.constant dense<0.000000e+00> : vector<4x16x16xf32>
    %31 = tpu.matmul %26, %28, %cst_10 {dimension_numbers = #tpu.dot_dimension_numbers<[2], [2], [1], [1], [0, 0, 0, 1, 1, 1], [0], [0]>} : vector<4x16x8xbf16>, vector<4x16x8xbf16>, vector<4x16x16xf32> -> vector<4x16x16xf32>
    "tpu.trace_stop"() : () -> ()
    %c0_11 = arith.constant 0 : index
    %c0_12 = arith.constant 0 : index
    %32 = vector.load %arg2[%c0_11, %c0_12] : memref<16x16xf32, #tpu.memory_space<vmem>>, vector<16x16xf32>
    %33 = vector.shape_cast %32 : vector<16x16xf32> to vector<1x16x16xf32>
    %34 = vector.broadcast %33 : vector<1x16x16xf32> to vector<4x16x16xf32>
    %35 = arith.addf %31, %34 : vector<4x16x16xf32>
    %cst_13 = arith.constant dense<0xFF800000> : vector<4x16xf32>
    %36 = vector.multi_reduction <maximumf>, %35, %cst_13 [2] : vector<4x16x16xf32> to vector<4x16xf32>
    %37 = vector.shape_cast %36 : vector<4x16xf32> to vector<4x16x1xf32>
    %38 = vector.broadcast %37 : vector<4x16x1xf32> to vector<4x16x16xf32>
    %39 = arith.subf %35, %38 : vector<4x16x16xf32>
    %40 = math.exp %39 : vector<4x16x16xf32>
    %cst_14 = arith.constant dense<0.000000e+00> : vector<4x16xf32>
    %41 = vector.multi_reduction <add>, %40, %cst_14 [2] : vector<4x16x16xf32> to vector<4x16xf32>
    %42 = vector.shape_cast %41 : vector<4x16xf32> to vector<4x16x1xf32>
    %43 = tpu.reciprocal %42 {approx = true} : vector<4x16x1xf32> -> vector<4x16x1xf32>
    %44 = vector.broadcast %43 : vector<4x16x1xf32> to vector<4x16x16xf32>
    %45 = arith.mulf %40, %44 : vector<4x16x16xf32>
    %46 = arith.truncf %45 : vector<4x16x16xf32> to vector<4x16x16xbf16>
    "tpu.trace_start"() <{level = 10 : i32, message = "nqk,nkd->nqd"}> : () -> ()
    %cst_15 = arith.constant dense<0.000000e+00> : vector<4x16x8xf32>
    %47 = tpu.matmul %46, %30, %cst_15 {dimension_numbers = #tpu.dot_dimension_numbers<[2], [1], [1], [2], [0, 0, 0, 1, 1, 2], [0], [0]>} : vector<4x16x16xbf16>, vector<4x16x8xbf16>, vector<4x16x8xf32> -> vector<4x16x8xf32>
    "tpu.trace_stop"() : () -> ()
    %48 = tpu.transpose %47, [1, 0, 2] : vector<4x16x8xf32> -> vector<16x4x8xf32>
    %49 = vector.shape_cast %48 : vector<16x4x8xf32> to vector<16x32xf32>
    %50 = arith.truncf %49 : vector<16x32xf32> to vector<16x32xbf16>
    %c0_16 = arith.constant 0 : index
    %c0_17 = arith.constant 0 : index
    %c0_18 = arith.constant 0 : index
    %51 = vector.load %arg5[%c0_16, %c0_17, %c0_18] : memref<1x32x32xbf16, #tpu.memory_space<vmem>>, vector<1x32x32xbf16>
    %52 = vector.shape_cast %51 : vector<1x32x32xbf16> to vector<32x32xbf16>
    %cst_19 = arith.constant dense<0.000000e+00> : vector<16x32xf32>
    %53 = tpu.matmul %50, %52, %cst_19 {dimension_numbers = #tpu.dot_dimension_numbers<[1], [0], [0], [1], [0, 0, 1, 1], [], []>} : vector<16x32xbf16>, vector<32x32xbf16>, vector<16x32xf32> -> vector<16x32xf32>
    %54 = arith.addf %3, %53 : vector<16x32xf32>
    %c0_20 = arith.constant 0 : index
    %c0_21 = arith.constant 0 : index
    %55 = vector.load %arg6[%c0_20, %c0_21] : memref<1x32xf32, #tpu.memory_space<vmem>>, vector<1x32xf32>
    %56 = vector.shape_cast %55 : vector<1x32xf32> to vector<32xf32>
    %57 = arith.mulf %54, %54 : vector<16x32xf32>
    %cst_22 = arith.constant dense<0.000000e+00> : vector<16xf32>
    %58 = vector.multi_reduction <add>, %57, %cst_22 [1] : vector<16x32xf32> to vector<16xf32>
    %59 = vector.shape_cast %58 : vector<16xf32> to vector<16x1xf32>
    %cst_23 = arith.constant 3.200000e+01 : f32
    %60 = vector.broadcast %cst_23 : f32 to vector<16x1xf32>
    %61 = arith.divf %59, %60 : vector<16x1xf32>
    %cst_24 = arith.constant 9.99999997E-7 : f32
    %62 = vector.broadcast %cst_24 : f32 to vector<16x1xf32>
    %63 = arith.addf %61, %62 : vector<16x1xf32>
    %64 = math.rsqrt %63 : vector<16x1xf32>
    %65 = vector.broadcast %64 : vector<16x1xf32> to vector<16x32xf32>
    %66 = arith.mulf %54, %65 : vector<16x32xf32>
    %67 = vector.shape_cast %56 : vector<32xf32> to vector<1x32xf32>
    %68 = vector.broadcast %67 : vector<1x32xf32> to vector<16x32xf32>
    %69 = arith.mulf %66, %68 : vector<16x32xf32>
    %70 = arith.truncf %69 : vector<16x32xf32> to vector<16x32xbf16>
    %c0_25 = arith.constant 0 : index
    %c0_26 = arith.constant 0 : index
    %c0_27 = arith.constant 0 : index
    %71 = vector.load %arg7[%c0_25, %c0_26, %c0_27] : memref<1x32x128xbf16, #tpu.memory_space<vmem>>, vector<1x32x128xbf16>
    %72 = vector.shape_cast %71 : vector<1x32x128xbf16> to vector<32x128xbf16>
    %cst_28 = arith.constant dense<0.000000e+00> : vector<16x128xf32>
    %73 = tpu.matmul %70, %72, %cst_28 {dimension_numbers = #tpu.dot_dimension_numbers<[1], [0], [0], [1], [0, 0, 1, 1], [], []>} : vector<16x32xbf16>, vector<32x128xbf16>, vector<16x128xf32> -> vector<16x128xf32>
    %74 = vector.extract_strided_slice %73 {offsets = [0, 0], sizes = [16, 64], strides = [1, 1]} : vector<16x128xf32> to vector<16x64xf32>
    %75 = vector.extract_strided_slice %73 {offsets = [0, 64], sizes = [16, 64], strides = [1, 1]} : vector<16x128xf32> to vector<16x64xf32>
    %76 = arith.negf %74 : vector<16x64xf32>
    %77 = math.exp %76 : vector<16x64xf32>
    %cst_29 = arith.constant 1.000000e+00 : f32
    %78 = vector.broadcast %cst_29 : f32 to vector<16x64xf32>
    %79 = arith.addf %78, %77 : vector<16x64xf32>
    %80 = arith.divf %78, %79 : vector<16x64xf32>
    %81 = arith.mulf %74, %80 : vector<16x64xf32>
    %82 = arith.mulf %81, %75 : vector<16x64xf32>
    %83 = arith.truncf %82 : vector<16x64xf32> to vector<16x64xbf16>
    %c0_30 = arith.constant 0 : index
    %c0_31 = arith.constant 0 : index
    %c0_32 = arith.constant 0 : index
    %84 = vector.load %arg8[%c0_30, %c0_31, %c0_32] : memref<1x64x32xbf16, #tpu.memory_space<vmem>>, vector<1x64x32xbf16>
    %85 = vector.shape_cast %84 : vector<1x64x32xbf16> to vector<64x32xbf16>
    %cst_33 = arith.constant dense<0.000000e+00> : vector<16x32xf32>
    %86 = tpu.matmul %83, %85, %cst_33 {dimension_numbers = #tpu.dot_dimension_numbers<[1], [0], [0], [1], [0, 0, 1, 1], [], []>} : vector<16x64xbf16>, vector<64x32xbf16>, vector<16x32xf32> -> vector<16x32xf32>
    %87 = arith.addf %54, %86 : vector<16x32xf32>
    %c0_34 = arith.constant 0 : index
    %c0_35 = arith.constant 0 : index
    %88 = vector.load %arg10[%c0_34, %c0_35] : memref<16x32xf32, #tpu.memory_space<vmem>>, vector<16x32xf32>
    tpu.vector_store %arg10[%c0_34, %c0_35], %87 {strides = array<i32>} : memref<16x32xf32, #tpu.memory_space<vmem>>, vector<16x32xf32>,
    %c0_36 = arith.constant 0 : index
    %c0_37 = arith.constant 0 : index
    %89 = vector.load %arg9[%c0_36, %c0_37] : memref<16x32xf32, #tpu.memory_space<vmem>>, vector<16x32xf32>
    tpu.vector_store %arg9[%c0_36, %c0_37], %87 {strides = array<i32>} : memref<16x32xf32, #tpu.memory_space<vmem>>, vector<16x32xf32>,
    return
  }
  func.func @transform_0(%arg0: i32) -> (i32, i32) {
    %c0_i32 = arith.constant 0 : i32
    %c0_i32_0 = arith.constant 0 : i32
    %c0_i32_1 = arith.constant 0 : i32
    return %c0_i32, %c0_i32_0 : i32, i32
  }
  func.func @transform_1(%arg0: i32) -> (i32, i32) {
    %c0_i32 = arith.constant 0 : i32
    %c0_i32_0 = arith.constant 0 : i32
    %c0_i32_1 = arith.constant 0 : i32
    return %c0_i32, %c0_i32_0 : i32, i32
  }
  func.func @transform_2(%arg0: i32) -> (i32, i32) {
    %c0_i32 = arith.constant 0 : i32
    %c0_i32_0 = arith.constant 0 : i32
    return %arg0, %c0_i32 : i32, i32
  }
  func.func @transform_3(%arg0: i32) -> (i32, i32, i32) {
    %c0_i32 = arith.constant 0 : i32
    %c0_i32_0 = arith.constant 0 : i32
    %c0_i32_1 = arith.constant 0 : i32
    return %arg0, %c0_i32, %c0_i32_0 : i32, i32, i32
  }
  func.func @transform_4(%arg0: i32) -> (i32, i32, i32) {
    %c0_i32 = arith.constant 0 : i32
    %c0_i32_0 = arith.constant 0 : i32
    %c0_i32_1 = arith.constant 0 : i32
    return %arg0, %c0_i32, %c0_i32_0 : i32, i32, i32
  }
  func.func @transform_5(%arg0: i32) -> (i32, i32) {
    %c0_i32 = arith.constant 0 : i32
    %c0_i32_0 = arith.constant 0 : i32
    return %arg0, %c0_i32 : i32, i32
  }
  func.func @transform_6(%arg0: i32) -> (i32, i32, i32) {
    %c0_i32 = arith.constant 0 : i32
    %c0_i32_0 = arith.constant 0 : i32
    %c0_i32_1 = arith.constant 0 : i32
    return %arg0, %c0_i32, %c0_i32_0 : i32, i32, i32
  }
  func.func @transform_7(%arg0: i32) -> (i32, i32, i32) {
    %c0_i32 = arith.constant 0 : i32
    %c0_i32_0 = arith.constant 0 : i32
    %c0_i32_1 = arith.constant 0 : i32
    return %arg0, %c0_i32, %c0_i32_0 : i32, i32, i32
  }
  func.func @transform_8(%arg0: i32) -> (i32, i32) {
    %c0_i32 = arith.constant 0 : i32
    %c0_i32_0 = arith.constant 0 : i32
    %c0_i32_1 = arith.constant 0 : i32
    return %c0_i32, %c0_i32_0 : i32, i32
  }
}

</mosaic_0001>

<bundles_post_ra>
// kernel: bitformer_forward.1
= control target key start
LH: loop header
LB: loop body
LE: loop exit
PB: predicated region body
PF: predicated region fallthrough
CT: control target
= control target key end

     0   :  { %13 = vsyncpa [#allocation4], 0  ;;  %s2905_s0 = inlined_call_operand.vmem [shape: f32[16,32], index: 0, kind: input, shape index: {}]   ;;  %s2906_s1 = inlined_call_operand.vmem [shape: f32[16,16], index: 1, kind: input, shape index: {}]   ;;  %s2907_s2 = inlined_call_operand.vmem [shape: f32[1,32], index: 2, kind: input, shape index: {}]   ;;  %s2908_s3 = inlined_call_operand.vmem [shape: bf16[1,32,96], index: 3, kind: input, shape index: {}]   ;;  %s2909_s4 = inlined_call_operand.hbm [shape: bf16[1,32,32], index: 4, kind: input, shape index: {}]   ;;  %s2910_s5 = inlined_call_operand.vmem [shape: f32[1,32], index: 5, kind: input, shape index: {}]   ;;  %s2911_s6 = inlined_call_operand.hbm [shape: bf16[1,32,128], index: 6, kind: input, shape index: {}]   ;;  %s2912_s7 = inlined_call_operand.vmem [shape: bf16[1,64,32], index: 7, kind: input, shape index: {}]   ;;  %s2913_s8 = inlined_call_operand.hbm [shape: f32[16,32], index: 8, kind: output, shape index: {}]  }
   0x1   :  { %14 = vsyncpa [#allocation7], 0 }
   0x2   :  { %15 = vsyncpa [#allocation5], 0  ;;  %s2426_s27 = smov [#allocation3]   ;;  %s2354_s9 = scalar_lea.hbm %s2909_s4, 256 }
   0x3   :  { %s29_s28 = sshll.u32 %s2426_s27, 4  ;;  %p2355_p0 = scmp.ne.s32.totalorder %s2909_s4, %s2354_s9  ;;  %s30_s28 = int_to_ptr.vmem [resolvable:$true] %s29_s28 }
   0x4   :  { %p2358_p1 = scmp.lt.u32.totalorder %s2354_s9, %s2909_s4 }
   0x6   :  { %p2360_p2 = pnand %p2358_p1, %p2355_p0 }
   0x8   :  { %2363 = shalt.err (!%p2360_p2)
}
   0x9   :  { %s2364_s14 = scalar_lea.vmem %s30_s28, 256  ;;  %p2369_p4 = scmp.lt.s32.totalorder %s30_s28, %s30_s28 }
   0xa   :  { %p2365_p3 = scmp.ne.s32.totalorder %s30_s28, %s2364_s14  ;;  %p2370_p5 = scmp.lt.s32.totalorder %s2364_s14, %s2364_s14 }
   0xc   :  { %p2371_p6 = por %p2370_p5, %p2369_p4 }
   0xe   :  { %p2372_p7 = pnand %p2371_p6, %p2365_p3 }
  0x10   :  { %2375 = shalt.err (!%p2372_p7)
}
  0x11   :  { %s2427_s15 = smov 64   ;;  %s2428_s16 = smov 4  }
  0x12   :  { %35 = dma.hbm_to_vmem [thread:$0]  %s2909_s4, 256, %s30_s28, [#allocation4], %s2427_s15, %s2427_s15, %s2428_s16  }
  0x13   :  { %s2429_s19 = smov [#allocation6]   ;;  %s2376_s23 = scalar_lea.hbm %s2911_s6, 256 }
  0x14   :  { %s43_s20 = sshll.u32 %s2429_s19, 4  ;;  %p2377_p8 = scmp.ne.s32.totalorder %s2911_s6, %s2376_s23  ;;  %s44_s20 = int_to_ptr.vmem [resolvable:$true] %s43_s20 }
  0x15   :  { %p2380_p9 = scmp.lt.u32.totalorder %s2376_s23, %s2911_s6 }
  0x17   :  { %p2382_p10 = pnand %p2380_p9, %p2377_p8 }
  0x19   :  { %2385 = shalt.err (!%p2382_p10)
}
  0x1a   :  { %s2386_s29 = scalar_lea.vmem %s44_s20, 256  ;;  %p2391_p12 = scmp.lt.s32.totalorder %s44_s20, %s44_s20 }
  0x1b   :  { %p2387_p11 = scmp.ne.s32.totalorder %s44_s20, %s2386_s29  ;;  %p2392_p13 = scmp.lt.s32.totalorder %s2386_s29, %s2386_s29 }
  0x1d   :  { %p2393_p0 = por %p2392_p13, %p2391_p12 }
  0x1f   :  { %p2394_p1 = pnand %p2393_p0, %p2387_p11 }
  0x21   :  { %2397 = shalt.err (!%p2394_p1)
}
  0x22   :  { %49 = dma.hbm_to_vmem [thread:$0]  %s2911_s6, 256, %s44_s20, [#allocation7], %s2427_s15, %s2427_s15, %s2428_s16  }
  0x23   :  { %2420 = dma.done.wait [#allocation4], 256  }
  0x24   :  { %2421 = vsyncadd [#allocation4], 4294967040 }
  0x25   :  { %2422 = dma.done.wait [#allocation7], 256  }
  0x26   :  { %2423 = vsyncadd [#allocation7], 4294967040  ;;  %vm65_vm0 = vcmask 261120   ;;  %v63_v0 = vld [vmem:[%s2905_s0] sm:$0xff]  ;;  %v64_v1 = vld [vmem:[%s2905_s0 + $0x8] sm:$0xff]  ;;  %v2430_v9 = vmov 0.0   ;;  %v231_v31 = vlaneseq }
  0x27   :  { %66 = vst.msk [vmem:[#allocation2] sm:$0xff] %vm65_vm0, %v63_v0  ;;  %67 = vst.msk [vmem:[#allocation2 + $0x8] sm:$0xff] %vm65_vm0, %v64_v1  ;;  %v2294_v8 = vld [vmem:[%s2908_s3] sm:$0xff]   ;;  %2172 = vmatprep.subr.bf16.mxu0 %v2430_v9  ;;  %vm2431_vm1 = vmmov 0   ;;  %v2295_v10 = vld [vmem:[%s2908_s3 + $0x8] sm:$0xff]   ;;  %2180 = vmatprep.subr.bf16.mxu1 %v2430_v9  ;;  %s2432_s16 = smov 88  }
  0x28   :  { %2176 = vmatprep.mubr.msk.bf16.mxu0 %vm2431_vm1, %v2430_v9  ;;  %2173 = vmatpush3.bf16.msra.mxu0 %v2294_v8  ;;  %v2092_v20 = vld [vmem:[%s2907_s2] ss:$0 sm:$0xff]  ;;  %s2433_s17 = smov 96   ;;  %s2434_s2 = smov 80   ;;  %v2439_v29 = vmov 1983009808  }
  0x29   :  { %2174 = vmatprep.subr.bf16.mxu0 %v2430_v9  ;;  %2182 = vmatprep.mubr.msk.bf16.mxu1 %vm2431_vm1, %v2430_v9  ;;  %s2435_s18 = smov 120   ;;  %s2436_s19 = smov 72   ;;  %v229_v30 = vunpack.c.l.s4 %v2439_v29  ;;  %v232_v35 = vshrl.u32 %v231_v31, 7  ;;  %v2440_v38 = vmov 1934713408   ;;  %vm1056_vm2 = vcmask 64512  }
  0x2a   :  { %s2437_s20 = smov 112   ;;  %s2438_s21 = smov 104   ;;  %v293_v39 = vunpack.c.l.s4 %v2440_v38  ;;  %vm1245_vm3 = vcmask 130048   ;;  %vm1814_vm4 = vcmask 195584   ;;  %vm2023_vm5 = vcmask 523264  }
  0x2b   :  { %v230_v34 = vunpack.c.0.s8 %v229_v30  ;;  %s2442_s26 = smov 48   ;;  %s2443_s27 = smov 40  }
  0x2c   :  { %2175 = vmatpush3.bf16.msra.mxu0 %v2295_v10  ;;  %v294_v43 = vunpack.c.0.s8 %v293_v39  ;;  %s2444_s29 = smov 16   ;;  %s2445_s4 = smov 8  }
  0x2d   :  { %2186 = vmatprep.subr.bf16.mxu0 %v2430_v9  ;;  %v2570_v40 = vsub.s32 %v230_v34, %v232_v35  ;;  %s2446_s28 = smov 24  }
  0x2e   :  { %v68_v2 = vld [vmem:[#allocation2] sm:$0xff]  ;;  %v69_v3 = vld [vmem:[#allocation2 + $0x8] sm:$0xff]  ;;  %v2576_v52 = vsub.s32 %v294_v43, %v232_v35 }
  0x2f   :  { %v71_v4 = vmul.f32 %v68_v2, %v68_v2  ;;  %v72_v5 = vmul.f32 %v69_v3, %v69_v3 }
  0x31   :  { %v74_v6 = vsel %vm65_vm0, %v71_v4, 0.0  ;;  %v77_v7 = vsel %vm65_vm0, %v72_v5, 0.0 }
  0x32   :  { %75 = vadd.xlane.f32.xlu0 %v74_v6 }
  0x36   :  { %78 = vadd.xlane.f32.xlu0 %v77_v7 }
  0xbf   :  { %v76_v11 = vpop.xlane.xlu0 %75 }
  0xc0   :  { %v81_v12 = vmul.f32 0.03125, %v76_v11 }
  0xc2   :  { %v83_v13 = vadd.f32 1e-06, %v81_v12 }
  0xc3   :  { %v79_v14 = vpop.xlane.xlu0 %78 }
  0xc4   :  { %2304 = vrsqrt.f32 %v83_v13  ;;  %v82_v15 = vmul.f32 0.03125, %v79_v14 }
  0xc6   :  { %v84_v16 = vadd.f32 1e-06, %v82_v15 }
  0xc8   :  { %2306 = vrsqrt.f32 %v84_v16 }
  0xce   :  { %v2305_v17 = vpop.eup %2304 }
  0xcf   :  { %v87_v18 = vmul.f32 %v2305_v17, %v68_v2 }
  0xd1   :  { %v95_v22 = vmul.f32 %v2092_v20, %v87_v18 }
  0xd2   :  { %v2307_v19 = vpop.eup %2306 }
  0xd3   :  { %v88_v21 = vmul.f32 %v2307_v19, %v69_v3 }
  0xd5   :  { %v96_v23 = vmul.f32 %v2092_v20, %v88_v21 }
  0xd7   :  { %v97_v24 = vpack.c.bf16 %v96_v23, %v95_v22 }
  0xd9   :  { %2177 = vmatmul.mubr.msk.bf16.vlgmr.msra.gmra.mrb[0].mxu0 %vm65_vm0, %v97_v24 }
  0xda   :  { %2188 = vmatprep.mubr.msk.bf16.mxu0 %vm2431_vm1, %v2430_v9 }
 0x1ac   :  { %v2552_v25 = vpop.f32.mrb[0].mxu0 }
 0x1ad   :  { %184 = vrot.lane.b32.xlu0 %v2552_v25, %s2432_s16  ;;  %178 = vrot.lane.b32.xlu1 %v2552_v25, %s2433_s17  ;;  %v2178_v26 = vpop.f32.mrb[1].mxu0 }
 0x1ae   :  { %v2556_v27 = vpop.f32.mrb[2].mxu0 }
 0x1af   :  { %v2179_v28 = vpop.f32.mrb[3].mxu0 }
 0x1b1   :  { %190 = vrot.lane.b32.xlu1 %v2552_v25, %s2434_s2  ;;  %162 = vrot.lane.b32.xlu0 %v2556_v27, %s2435_s18 }
 0x1b5   :  { %196 = vrot.lane.b32.xlu1 %v2552_v25, %s2436_s19  ;;  %168 = vrot.lane.b32.xlu0 %v2556_v27, %s2437_s20 }
 0x1b9   :  { %160 = vrot.lane.b32.xlu1 %v2552_v25, %s2435_s18  ;;  %174 = vrot.lane.b32.xlu0 %v2556_v27, %s2438_s21 }
 0x1bd   :  { %180 = vrot.lane.b32.xlu1 %v2556_v27, %s2433_s17 }
 0x1c1   :  { %186 = vrot.lane.b32.xlu1 %v2556_v27, %s2432_s16 }
 0x1c5   :  { %192 = vrot.lane.b32.xlu1 %v2556_v27, %s2434_s2 }
 0x1c9   :  { %198 = vrot.lane.b32.xlu1 %v2556_v27, %s2436_s19 }
 0x1cd   :  { %166 = vrot.lane.b32.xlu1 %v2552_v25, %s2437_s20 }
 0x1d1   :  { %172 = vrot.lane.b32.xlu1 %v2552_v25, %s2438_s21 }
 0x21f   :  { %v185_v32 = vpop.permute.xlu0 %184  ;;  %v179_v33 = vpop.permute.xlu1 %178 }
 0x223   :  { %v191_v36 = vpop.permute.xlu1 %190  ;;  %v163_v37 = vpop.permute.xlu0 %162 }
 0x224   :  { %v258_v41 = vcombine.low %v179_v33, %v191_v36  ;;  %v259_v42 = vcombine.high %v179_v33, %v191_v36 }
 0x226   :  { %v266_v48 = vrot.slane %v258_v41, %v2570_v40  ;;  %v273_v49 = vrot.slane %v259_v42, %v2570_v40 }
 0x227   :  { %v197_v44 = vpop.permute.xlu1 %196  ;;  %v169_v45 = vpop.permute.xlu0 %168 }
 0x228   :  { %v274_v46 = vcombine.low %v185_v32, %v197_v44  ;;  %v275_v47 = vcombine.high %v185_v32, %v197_v44  ;;  %v430_v61 = vcombine.low %v2556_v27, %v169_v45  ;;  %v431_v62 = vcombine.high %v2556_v27, %v169_v45 }
 0x22a   :  { %v282_v50 = vrot.slane %v274_v46, %v2570_v40  ;;  %v289_v51 = vrot.slane %v275_v47, %v2570_v40  ;;  %v438_v6 = vrot.slane %v430_v61, %v2570_v40  ;;  %v445_v7 = vrot.slane %v431_v62, %v2570_v40 }
 0x22b   :  { %v2578_v53 = vpop.permute.xlu1 %160  ;;  %v175_v54 = vpop.permute.xlu0 %174 }
 0x22c   :  { %v322_v55 = vcombine.low %v266_v48, %v282_v50  ;;  %v323_v56 = vcombine.high %v266_v48, %v282_v50  ;;  %v338_v57 = vcombine.low %v273_v49, %v289_v51  ;;  %v339_v58 = vcombine.high %v273_v49, %v289_v51 }
 0x22d   :  { %v446_v59 = vcombine.low %v163_v37, %v175_v54  ;;  %v447_v60 = vcombine.high %v163_v37, %v175_v54 }
 0x22e   :  { %v330_v63 = vrot.slane %v322_v55, %v2576_v52  ;;  %v337_v0 = vrot.slane %v323_v56, %v2576_v52  ;;  %v346_v1 = vrot.slane %v338_v57, %v2576_v52  ;;  %v353_v2 = vrot.slane %v339_v58, %v2576_v52 }
 0x22f   :  { %v181_v3 = vpop.permute.xlu1 %180  ;;  %v454_v4 = vrot.slane %v446_v59, %v2570_v40  ;;  %v461_v5 = vrot.slane %v447_v60, %v2570_v40 }
 0x230   :  { %v2097_v8 = vcombine.low %v330_v63, %v337_v0  ;;  %v2099_v10 = vcombine.high %v330_v63, %v337_v0  ;;  %v2101_v11 = vcombine.low %v346_v1, %v353_v2  ;;  %v2103_v12 = vcombine.high %v346_v1, %v353_v2 }
 0x231   :  { %v494_v14 = vcombine.low %v438_v6, %v454_v4  ;;  %v495_v15 = vcombine.high %v438_v6, %v454_v4  ;;  %v510_v16 = vcombine.low %v445_v7, %v461_v5  ;;  %v511_v17 = vcombine.high %v445_v7, %v461_v5 }
 0x232   :  { %v649_v19 = vrot.slane %v2097_v8, %v2570_v40  ;;  %v665_v20 = vrot.slane %v2099_v10, %v2570_v40  ;;  %v681_v21 = vrot.slane %v2101_v11, %v2570_v40  ;;  %v697_v22 = vrot.slane %v2103_v12, %v2570_v40 }
 0x233   :  { %v187_v13 = vpop.permute.xlu1 %186  ;;  %v502_v23 = vrot.slane %v494_v14, %v2576_v52  ;;  %v509_v24 = vrot.slane %v495_v15, %v2576_v52  ;;  %v518_v26 = vrot.slane %v510_v16, %v2576_v52  ;;  %v525_v28 = vrot.slane %v511_v17, %v2576_v52 }
 0x234   :  { %v714_v32 = vcombine.low %v649_v19, %v665_v20  ;;  %v746_v33 = vcombine.low %v681_v21, %v697_v22  ;;  %v715_v34 = vcombine.high %v649_v19, %v665_v20  ;;  %v747_v35 = vcombine.high %v681_v21, %v697_v22 }
 0x235   :  { %v2104_v38 = vcombine.low %v502_v23, %v509_v24  ;;  %v2106_v39 = vcombine.high %v502_v23, %v509_v24  ;;  %v2108_v41 = vcombine.low %v518_v26, %v525_v28  ;;  %v2110_v42 = vcombine.high %v518_v26, %v525_v28 }
 0x236   :  { %v2603_v48 = vrot.slane %v714_v32, %v2576_v52  ;;  %v2606_v49 = vrot.slane %v746_v33, %v2576_v52  ;;  %v2609_v50 = vrot.slane %v715_v34, %v2576_v52  ;;  %v2612_v51 = vrot.slane %v747_v35, %v2576_v52 }
 0x237   :  { %v193_v18 = vpop.permute.xlu1 %192  ;;  %v2615_v58 = vrot.slane %v2104_v38, %v2570_v40  ;;  %v2618_v59 = vrot.slane %v2106_v39, %v2570_v40  ;;  %v2621_v60 = vrot.slane %v2108_v41, %v2570_v40  ;;  %v2624_v61 = vrot.slane %v2110_v42, %v2570_v40 }
 0x238   :  { %v462_v29 = vcombine.low %v181_v3, %v193_v18  ;;  %v463_v30 = vcombine.high %v181_v3, %v193_v18  ;;  %v766_v5 = vcombine.low %v2603_v48, %v2606_v49  ;;  %v767_v6 = vcombine.high %v2603_v48, %v2606_v49 }
 0x239   :  { %v835_v12 = vcombine.high %v2615_v58, %v2618_v59  ;;  %v866_v28 = vcombine.low %v2621_v60, %v2624_v61 }
 0x23a   :  { %v470_v43 = vrot.slane %v462_v29, %v2570_v40  ;;  %v477_v44 = vrot.slane %v463_v30, %v2570_v40 }
 0x23b   :  { %v199_v31 = vpop.permute.xlu1 %198  ;;  %v849_v42 = vrot.slane %v835_v12, %v2576_v52  ;;  %v768_v12 = vcombine.low %v2609_v50, %v2612_v51 }
 0x23c   :  { %v478_v36 = vcombine.low %v187_v13, %v199_v31  ;;  %v479_v37 = vcombine.high %v187_v13, %v199_v31  ;;  %v867_v13 = vcombine.high %v2621_v60, %v2624_v61 }
 0x23e   :  { %v486_v45 = vrot.slane %v478_v36, %v2570_v40  ;;  %v493_v46 = vrot.slane %v479_v37, %v2570_v40 }
 0x23f   :  { %v167_v47 = vpop.permute.xlu1 %166 }
 0x240   :  { %v526_v54 = vcombine.low %v470_v43, %v486_v45  ;;  %v527_v55 = vcombine.high %v470_v43, %v486_v45  ;;  %v542_v56 = vcombine.low %v477_v44, %v493_v46  ;;  %v543_v57 = vcombine.high %v477_v44, %v493_v46 }
 0x241   :  { %v226_v2 = vcombine.low %v2552_v25, %v167_v47  ;;  %v227_v3 = vcombine.high %v2552_v25, %v167_v47  ;;  %v881_v43 = vrot.slane %v867_v13, %v2576_v52 }
 0x242   :  { %v534_v62 = vrot.slane %v526_v54, %v2576_v52  ;;  %v541_v63 = vrot.slane %v527_v55, %v2576_v52  ;;  %v550_v0 = vrot.slane %v542_v56, %v2576_v52  ;;  %v557_v1 = vrot.slane %v543_v57, %v2576_v52 }
 0x243   :  { %v173_v4 = vpop.permute.xlu1 %172  ;;  %v234_v20 = vrot.slane %v226_v2, %v2570_v40  ;;  %v241_v21 = vrot.slane %v227_v3, %v2570_v40 }
 0x244   :  { %v2105_v7 = vcombine.low %v534_v62, %v541_v63  ;;  %v2107_v8 = vcombine.high %v534_v62, %v541_v63  ;;  %v2109_v10 = vcombine.low %v550_v0, %v557_v1  ;;  %v2111_v11 = vcombine.high %v550_v0, %v557_v1 }
 0x245   :  { %v242_v14 = vcombine.low %v2578_v53, %v173_v4  ;;  %v243_v15 = vcombine.high %v2578_v53, %v173_v4  ;;  %v834_v53 = vcombine.low %v2615_v58, %v2618_v59  ;;  %v874_v1 = vrot.slane %v866_v28, %v2576_v52 }
 0x246   :  { %v785_v16 = vrot.slane %v2105_v7, %v2570_v40  ;;  %v801_v17 = vrot.slane %v2107_v8, %v2570_v40  ;;  %v817_v18 = vrot.slane %v2109_v10, %v2570_v40  ;;  %v833_v19 = vrot.slane %v2111_v11, %v2570_v40 }
 0x247   :  { %v250_v22 = vrot.slane %v242_v14, %v2570_v40  ;;  %v257_v23 = vrot.slane %v243_v15, %v2570_v40  ;;  %v842_v0 = vrot.slane %v834_v53, %v2576_v52 }
 0x248   :  { %v850_v24 = vcombine.low %v785_v16, %v801_v17  ;;  %v882_v26 = vcombine.low %v817_v18, %v833_v19  ;;  %v851_v35 = vcombine.high %v785_v16, %v801_v17  ;;  %v883_v36 = vcombine.high %v817_v18, %v833_v19 }
 0x249   :  { %v290_v29 = vcombine.low %v234_v20, %v250_v22  ;;  %v291_v30 = vcombine.high %v234_v20, %v250_v22  ;;  %v306_v31 = vcombine.low %v241_v21, %v257_v23  ;;  %v307_v32 = vcombine.high %v241_v21, %v257_v23 }
 0x24a   :  { %v858_v33 = vrot.slane %v850_v24, %v2576_v52  ;;  %v890_v34 = vrot.slane %v882_v26, %v2576_v52  ;;  %v865_v56 = vrot.slane %v851_v35, %v2576_v52  ;;  %v897_v57 = vrot.slane %v883_v36, %v2576_v52 }
 0x24b   :  { %v298_v37 = vrot.slane %v290_v29, %v2576_v52  ;;  %v305_v38 = vrot.slane %v291_v30, %v2576_v52  ;;  %v314_v39 = vrot.slane %v306_v31, %v2576_v52  ;;  %v321_v41 = vrot.slane %v307_v32, %v2576_v52 }
 0x24c   :  { %v902_v44 = vcombine.low %v858_v33, %v890_v34  ;;  %v903_v45 = vcombine.high %v858_v33, %v890_v34  ;;  %v905_v7 = vcombine.high %v865_v56, %v897_v57  ;;  %v898_v14 = vcombine.low %v842_v0, %v874_v1  ;;  %v1055_v33 = vld [vmem:[%s2906_s1 + $0x8] sm:$0xff] }
 0x24d   :  { %v2096_v46 = vcombine.low %v298_v37, %v305_v38  ;;  %v2098_v47 = vcombine.high %v298_v37, %v305_v38  ;;  %v2100_v48 = vcombine.low %v314_v39, %v321_v41  ;;  %v2102_v49 = vcombine.high %v314_v39, %v321_v41 }
 0x24e   :  { %v1046_v54 = vpack.c.bf16 %v902_v44, %v766_v5  ;;  %v1047_v55 = vpack.c.bf16 %v903_v45, %v767_v6  ;;  %v904_v6 = vcombine.low %v865_v56, %v897_v57  ;;  %v899_v15 = vcombine.high %v842_v0, %v874_v1 }
 0x24f   :  { %v642_v58 = vrot.slane %v2096_v46, %v2570_v40  ;;  %v658_v59 = vrot.slane %v2098_v47, %v2570_v40  ;;  %v674_v60 = vrot.slane %v2100_v48, %v2570_v40  ;;  %v690_v61 = vrot.slane %v2102_v49, %v2570_v40 }
 0x250   :  { %v1061_v62 = vsel %vm1056_vm2, %v1046_v54, 0  ;;  %v1108_v63 = vsel %vm1056_vm2, %v1047_v55, 0  ;;  %v769_v16 = vcombine.high %v2609_v50, %v2612_v51  ;;  %v900_v18 = vcombine.low %v849_v42, %v881_v43  ;;  %v1054_v51 = vld [vmem:[%s2906_s1] sm:$0xff]  ;;  %s2441_s1 = smov 56  }
 0x251   :  { %v699_v2 = vcombine.high %v642_v58, %v658_v59  ;;  %v731_v3 = vcombine.high %v674_v60, %v690_v61  ;;  %2181 = vmatpush3.bf16.xpose.msra.mxu1 %v1061_v62  ;;  %2187 = vmatpush3.bf16.xpose.msra.mxu0 %v1108_v63  ;;  %v698_v4 = vcombine.low %v642_v58, %v658_v59 }
 0x252   :  { %v730_v5 = vcombine.low %v674_v60, %v690_v61  ;;  %2192 = vmatprep.subr.bf16.mxu1 %v2430_v9  ;;  %2198 = vmatprep.subr.bf16.mxu0 %v2430_v9  ;;  %v901_v20 = vcombine.high %v849_v42, %v881_v43  ;;  %v1048_v23 = vpack.c.bf16 %v904_v6, %v768_v12 }
 0x253   :  { %v713_v8 = vrot.slane %v699_v2, %v2576_v52  ;;  %v745_v10 = vrot.slane %v731_v3, %v2576_v52  ;;  %v706_v11 = vrot.slane %v698_v4, %v2576_v52  ;;  %v1049_v24 = vpack.c.bf16 %v905_v7, %v769_v16 }
 0x254   :  { %v738_v13 = vrot.slane %v730_v5, %v2576_v52  ;;  %v1155_v30 = vsel %vm1056_vm2, %v1048_v23, 0 }
 0x255   :  { %v764_v17 = vcombine.low %v713_v8, %v745_v10  ;;  %v765_v19 = vcombine.high %v713_v8, %v745_v10  ;;  %v1202_v50 = vsel %vm1056_vm2, %v1049_v24, 0 }
 0x256   :  { %v762_v21 = vcombine.low %v706_v11, %v738_v13  ;;  %v763_v22 = vcombine.high %v706_v11, %v738_v13 }
 0x257   :  { %v1044_v26 = vpack.c.bf16 %v900_v18, %v764_v17  ;;  %v1045_v53 = vpack.c.bf16 %v901_v20, %v765_v19 }
 0x258   :  { %v1042_v28 = vpack.c.bf16 %v898_v14, %v762_v21  ;;  %v1043_v29 = vpack.c.bf16 %v899_v15, %v763_v22 }
 0x25a   :  { %2183 = vmatmul.mubr.msk.bf16.vlgmr.msra.gmra.mrb[0].mxu1 %vm1056_vm2, %v1042_v28  ;;  %2189 = vmatmul.mubr.msk.bf16.vlgmr.msra.gmra.mrb[4].mxu0 %vm1056_vm2, %v1043_v29 }
 0x25b   :  { %2193 = vmatpush3.bf16.xpose.msra.mxu1 %v1155_v30  ;;  %2199 = vmatpush3.bf16.xpose.msra.mxu0 %v1202_v50 }
 0x25c   :  { %2194 = vmatprep.mubr.msk.bf16.mxu1 %vm2431_vm1, %v2430_v9  ;;  %2200 = vmatprep.mubr.msk.bf16.mxu0 %vm2431_vm1, %v2430_v9 }
 0x25d   :  { %2204 = vmatprep.subr.bf16.mxu1 %v2430_v9  ;;  %2210 = vmatprep.subr.bf16.mxu0 %v2430_v9 }
 0x262   :  { %2195 = vmatmul.mubr.msk.bf16.vlgmr.msra.gmra.mrb[4].mxu1 %vm1056_vm2, %v1044_v26  ;;  %2201 = vmatmul.mubr.msk.bf16.vlgmr.msra.gmra.mrb[8].mxu0 %vm1056_vm2, %v1045_v53 }
 0x263   :  { %2206 = vmatprep.mubr.msk.bf16.mxu1 %vm2431_vm1, %v2430_v9  ;;  %2212 = vmatprep.mubr.msk.bf16.mxu0 %vm2431_vm1, %v2430_v9 }
 0x32d   :  { %v1097_v31 = vpop.f32.mrb[0].mxu1  ;;  %v1144_v32 = vpop.f32.mrb[4].mxu0 }
 0x32e   :  { %v1098_v34 = vadd.f32 %v1097_v31, %v1054_v51  ;;  %v1145_v35 = vadd.f32 %v1144_v32, %v1054_v51  ;;  %v2184_v36 = vpop.f32.mrb[1].mxu1  ;;  %v2190_v37 = vpop.f32.mrb[5].mxu0 }
 0x32f   :  { %v1100_v38 = vpop.f32.mrb[2].mxu1  ;;  %v1147_v39 = vpop.f32.mrb[6].mxu0 }
 0x330   :  { %v1101_v41 = vadd.f32 %v1100_v38, %v1055_v33  ;;  %v1148_v42 = vadd.f32 %v1147_v39, %v1055_v33  ;;  %v2185_v43 = vpop.f32.mrb[3].mxu1  ;;  %v2191_v44 = vpop.f32.mrb[7].mxu0  ;;  %v1246_v45 = vsel %vm1245_vm3, %v1098_v34, -inf  ;;  %v1252_v46 = vsel %vm1245_vm3, %v1145_v35, -inf }
 0x331   :  { %1247 = vmax.xlane.f32.xlu1 %v1246_v45  ;;  %1253 = vmax.xlane.f32.xlu0 %v1252_v46 }
 0x332   :  { %v1249_v47 = vsel %vm1245_vm3, %v1101_v41, -inf  ;;  %v1255_v48 = vsel %vm1245_vm3, %v1148_v42, -inf }
 0x335   :  { %v1191_v49 = vpop.f32.mrb[4].mxu1  ;;  %1250 = vmax.xlane.f32.xlu0 %v1249_v47  ;;  %1256 = vmax.xlane.f32.xlu1 %v1255_v48  ;;  %v1238_v54 = vpop.f32.mrb[8].mxu0 }
 0x336   :  { %v1192_v55 = vadd.f32 %v1191_v49, %v1054_v51  ;;  %v2196_v56 = vpop.f32.mrb[5].mxu1  ;;  %v2202_v57 = vpop.f32.mrb[9].mxu0  ;;  %v1239_v60 = vadd.f32 %v1238_v54, %v1054_v51 }
 0x337   :  { %v1194_v58 = vpop.f32.mrb[6].mxu1  ;;  %v1241_v59 = vpop.f32.mrb[10].mxu0 }
 0x338   :  { %v1195_v61 = vadd.f32 %v1194_v58, %v1055_v33  ;;  %v2197_v62 = vpop.f32.mrb[7].mxu1  ;;  %v2203_v63 = vpop.f32.mrb[11].mxu0  ;;  %v1258_v0 = vsel %vm1245_vm3, %v1192_v55, -inf  ;;  %v1242_v1 = vadd.f32 %v1241_v59, %v1055_v33  ;;  %v1264_v3 = vsel %vm1245_vm3, %v1239_v60, -inf }
 0x339   :  { %1259 = vmax.xlane.f32.xlu0 %v1258_v0 }
 0x33a   :  { %v1261_v2 = vsel %vm1245_vm3, %v1195_v61, -inf  ;;  %v1267_v4 = vsel %vm1245_vm3, %v1242_v1, -inf }
 0x33b   :  { %1262 = vmax.xlane.f32.xlu1 %v1261_v2 }
 0x33d   :  { %1265 = vmax.xlane.f32.xlu0 %v1264_v3 }
 0x33f   :  { %1268 = vmax.xlane.f32.xlu1 %v1267_v4 }
 0x350   :  { %204 = vrot.lane.b32.xlu1 %v2556_v27, %s2427_s15 }
 0x353   :  { %202 = vrot.lane.b32.xlu0 %v2552_v25, %s2427_s15 }
 0x354   :  { %208 = vrot.lane.b32.xlu1 %v2552_v25, %s2441_s1 }
 0x357   :  { %210 = vrot.lane.b32.xlu0 %v2556_v27, %s2441_s1 }
 0x358   :  { %214 = vrot.lane.b32.xlu1 %v2552_v25, %s2442_s26 }
 0x35b   :  { %216 = vrot.lane.b32.xlu0 %v2556_v27, %s2442_s26 }
 0x35c   :  { %220 = vrot.lane.b32.xlu1 %v2552_v25, %s2443_s27 }
 0x35f   :  { %222 = vrot.lane.b32.xlu0 %v2556_v27, %s2443_s27 }
 0x3be   :  { %v1248_v5 = vpop.xlane.xlu1 %1247  ;;  %v1254_v6 = vpop.xlane.xlu0 %1253 }
 0x3bf   :  { %v1270_v7 = vsub.f32 %v1098_v34, %v1248_v5  ;;  %v1272_v8 = vsub.f32 %v1145_v35, %v1254_v6 }
 0x3c1   :  { %v1278_v10 = vmul.f32 1.442695, %v1270_v7  ;;  %v1282_v11 = vmul.f32 1.442695, %v1272_v8 }
 0x3c2   :  { %v1251_v12 = vpop.xlane.xlu0 %1250  ;;  %v1257_v13 = vpop.xlane.xlu1 %1256 }
 0x3c3   :  { %2308 = vpow2.f32 %v1278_v10  ;;  %v1271_v14 = vsub.f32 %v1101_v41, %v1251_v12  ;;  %v1273_v15 = vsub.f32 %v1148_v42, %v1257_v13 }
 0x3c4   :  { %2310 = vpow2.f32 %v1282_v11 }
 0x3c5   :  { %v1280_v16 = vmul.f32 1.442695, %v1271_v14  ;;  %v1284_v17 = vmul.f32 1.442695, %v1273_v15 }
 0x3c6   :  { %v1260_v18 = vpop.xlane.xlu0 %1259 }
 0x3c7   :  { %2312 = vpow2.f32 %v1280_v16  ;;  %v1274_v19 = vsub.f32 %v1192_v55, %v1260_v18 }
 0x3c8   :  { %v1263_v25 = vpop.xlane.xlu1 %1262  ;;  %2314 = vpow2.f32 %v1284_v17 }
 0x3c9   :  { %v1286_v27 = vmul.f32 1.442695, %v1274_v19  ;;  %v1275_v20 = vsub.f32 %v1195_v61, %v1263_v25 }
 0x3ca   :  { %v1266_v21 = vpop.xlane.xlu0 %1265 }
 0x3cb   :  { %v1288_v22 = vmul.f32 1.442695, %v1275_v20  ;;  %v1276_v23 = vsub.f32 %v1239_v60, %v1266_v21  ;;  %2316 = vpow2.f32 %v1286_v27 }
 0x3cc   :  { %v1269_v24 = vpop.xlane.xlu1 %1268 }
 0x3cd   :  { %v2722_v26 = vpop.eup %2308  ;;  %2318 = vpow2.f32 %v1288_v22  ;;  %v1290_v53 = vmul.f32 1.442695, %v1276_v23  ;;  %v1277_v28 = vsub.f32 %v1242_v1, %v1269_v24 }
 0x3ce   :  { %v203_v29 = vpop.permute.xlu0 %202  ;;  %v1294_v30 = vsel %vm1245_vm3, %v2722_v26, 0.0  ;;  %v2726_v50 = vpop.eup %2310 }
 0x3cf   :  { %2320 = vpow2.f32 %v1290_v53  ;;  %v1292_v51 = vmul.f32 1.442695, %v1277_v28  ;;  %1295 = vadd.xlane.f32.xlu0 %v1294_v30  ;;  %v1300_v34 = vsel %vm1245_vm3, %v2726_v50, 0.0 }
 0x3d0   :  { %v205_v31 = vpop.permute.xlu1 %204 }
 0x3d1   :  { %v2728_v32 = vpop.eup %2312  ;;  %2322 = vpow2.f32 %v1292_v51 }
 0x3d2   :  { %v211_v33 = vpop.permute.xlu0 %210  ;;  %v1297_v35 = vsel %vm1245_vm3, %v2728_v32, 0.0  ;;  %v2734_v36 = vpop.eup %2314 }
 0x3d3   :  { %1301 = vadd.xlane.f32.xlu0 %v1300_v34  ;;  %1298 = vadd.xlane.f32.xlu1 %v1297_v35  ;;  %v1303_v41 = vsel %vm1245_vm3, %v2734_v36, 0.0 }
 0x3d4   :  { %v209_v37 = vpop.permute.xlu1 %208 }
 0x3d5   :  { %v2736_v38 = vpop.eup %2316 }
 0x3d6   :  { %v217_v39 = vpop.permute.xlu0 %216  ;;  %v1306_v49 = vsel %vm1245_vm3, %v2736_v38, 0.0 }
 0x3d7   :  { %v2740_v42 = vpop.eup %2318  ;;  %v566_v43 = vcombine.low %v205_v31, %v217_v39  ;;  %1304 = vadd.xlane.f32.xlu1 %v1303_v41  ;;  %v567_v44 = vcombine.high %v205_v31, %v217_v39 }
 0x3d8   :  { %v215_v45 = vpop.permute.xlu1 %214  ;;  %v1309_v46 = vsel %vm1245_vm3, %v2740_v42, 0.0 }
 0x3d9   :  { %v2744_v47 = vpop.eup %2320  ;;  %1310 = vadd.xlane.f32.xlu0 %v1309_v46  ;;  %v574_v55 = vrot.slane %v566_v43, %v2570_v40  ;;  %v581_v58 = vrot.slane %v567_v44, %v2570_v40  ;;  %v362_v59 = vcombine.low %v203_v29, %v215_v45  ;;  %v363_v60 = vcombine.high %v203_v29, %v215_v45 }
 0x3da   :  { %v223_v48 = vpop.permute.xlu0 %222  ;;  %v1312_v62 = vsel %vm1245_vm3, %v2744_v47, 0.0 }
 0x3db   :  { %v2748_v54 = vpop.eup %2322  ;;  %v582_v56 = vcombine.low %v211_v33, %v223_v48  ;;  %v583_v57 = vcombine.high %v211_v33, %v223_v48  ;;  %1307 = vadd.xlane.f32.xlu1 %v1306_v49  ;;  %v370_v8 = vrot.slane %v362_v59, %v2570_v40  ;;  %v377_v10 = vrot.slane %v363_v60, %v2570_v40 }
 0x3dc   :  { %v221_v61 = vpop.permute.xlu1 %220  ;;  %v1315_v3 = vsel %vm1245_vm3, %v2748_v54, 0.0 }
 0x3dd   :  { %v590_v63 = vrot.slane %v582_v56, %v2570_v40  ;;  %v597_v0 = vrot.slane %v583_v57, %v2570_v40  ;;  %v378_v1 = vcombine.low %v209_v37, %v221_v61  ;;  %v379_v2 = vcombine.high %v209_v37, %v221_v61  ;;  %1313 = vadd.xlane.f32.xlu0 %v1312_v62 }
 0x3df   :  { %v598_v4 = vcombine.low %v574_v55, %v590_v63  ;;  %v599_v5 = vcombine.high %v574_v55, %v590_v63  ;;  %v614_v6 = vcombine.low %v581_v58, %v597_v0  ;;  %v615_v7 = vcombine.high %v581_v58, %v597_v0  ;;  %1316 = vadd.xlane.f32.xlu1 %v1315_v3 }
 0x3e0   :  { %v386_v11 = vrot.slane %v378_v1, %v2570_v40  ;;  %v393_v12 = vrot.slane %v379_v2, %v2570_v40 }
 0x3e1   :  { %v606_v13 = vrot.slane %v598_v4, %v2576_v52  ;;  %v613_v14 = vrot.slane %v599_v5, %v2576_v52  ;;  %v622_v15 = vrot.slane %v614_v6, %v2576_v52  ;;  %v629_v16 = vrot.slane %v615_v7, %v2576_v52 }
 0x3e2   :  { %v394_v17 = vcombine.low %v370_v8, %v386_v11  ;;  %v395_v18 = vcombine.high %v370_v8, %v386_v11  ;;  %v410_v19 = vcombine.low %v377_v10, %v393_v12  ;;  %v411_v25 = vcombine.high %v377_v10, %v393_v12 }
 0x3e3   :  { %v974_v27 = vcombine.low %v606_v13, %v613_v14  ;;  %v2114_v20 = vcombine.high %v606_v13, %v613_v14  ;;  %v990_v21 = vcombine.low %v622_v15, %v629_v16  ;;  %v2115_v22 = vcombine.high %v622_v15, %v629_v16 }
 0x3e4   :  { %v402_v23 = vrot.slane %v394_v17, %v2576_v52  ;;  %v409_v24 = vrot.slane %v395_v18, %v2576_v52  ;;  %v418_v53 = vrot.slane %v410_v19, %v2576_v52  ;;  %v425_v28 = vrot.slane %v411_v25, %v2576_v52 }
 0x3e5   :  { %v981_v29 = vrot.slane %v974_v27, %v2570_v40  ;;  %v989_v30 = vrot.slane %v2114_v20, %v2570_v40  ;;  %v997_v51 = vrot.slane %v990_v21, %v2570_v40  ;;  %v1005_v31 = vrot.slane %v2115_v22, %v2570_v40 }
 0x3e6   :  { %v906_v33 = vcombine.low %v402_v23, %v409_v24  ;;  %v2112_v34 = vcombine.high %v402_v23, %v409_v24  ;;  %v922_v35 = vcombine.low %v418_v53, %v425_v28  ;;  %v2113_v37 = vcombine.high %v418_v53, %v425_v28 }
 0x3e7   :  { %v1006_v39 = vcombine.low %v981_v29, %v989_v30  ;;  %v1022_v41 = vcombine.low %v997_v51, %v1005_v31  ;;  %v1007_v43 = vcombine.high %v981_v29, %v989_v30  ;;  %v1023_v44 = vcombine.high %v997_v51, %v1005_v31 }
 0x3e8   :  { %v913_v45 = vrot.slane %v906_v33, %v2570_v40  ;;  %v921_v46 = vrot.slane %v2112_v34, %v2570_v40  ;;  %v929_v48 = vrot.slane %v922_v35, %v2570_v40  ;;  %v937_v49 = vrot.slane %v2113_v37, %v2570_v40 }
 0x3e9   :  { %v1014_v55 = vrot.slane %v1006_v39, %v2576_v52  ;;  %v1030_v56 = vrot.slane %v1022_v41, %v2576_v52  ;;  %v1021_v57 = vrot.slane %v1007_v43, %v2576_v52  ;;  %v1037_v58 = vrot.slane %v1023_v44, %v2576_v52 }
 0x3ea   :  { %v938_v59 = vcombine.low %v913_v45, %v921_v46  ;;  %v954_v60 = vcombine.low %v929_v48, %v937_v49  ;;  %v939_v61 = vcombine.high %v913_v45, %v921_v46  ;;  %v955_v62 = vcombine.high %v929_v48, %v937_v49 }
 0x3eb   :  { %v1040_v63 = vcombine.low %v1021_v57, %v1037_v58  ;;  %v1041_v0 = vcombine.high %v1021_v57, %v1037_v58  ;;  %v1038_v5 = vcombine.low %v1014_v55, %v1030_v56  ;;  %v1039_v6 = vcombine.high %v1014_v55, %v1030_v56 }
 0x3ec   :  { %v946_v1 = vrot.slane %v938_v59, %v2576_v52  ;;  %v962_v2 = vrot.slane %v954_v60, %v2576_v52  ;;  %v953_v3 = vrot.slane %v939_v61, %v2576_v52  ;;  %v969_v4 = vrot.slane %v955_v62, %v2576_v52 }
 0x3ee   :  { %v970_v7 = vcombine.low %v946_v1, %v962_v2  ;;  %v971_v8 = vcombine.high %v946_v1, %v962_v2  ;;  %v972_v10 = vcombine.low %v953_v3, %v969_v4  ;;  %v973_v11 = vcombine.high %v953_v3, %v969_v4 }
 0x3f0   :  { %v1050_v12 = vpack.c.bf16 %v1038_v5, %v970_v7  ;;  %v1051_v13 = vpack.c.bf16 %v1039_v6, %v971_v8  ;;  %v1052_v14 = vpack.c.bf16 %v1040_v63, %v972_v10  ;;  %v1053_v15 = vpack.c.bf16 %v1041_v0, %v973_v11 }
 0x3f2   :  { %2205 = vmatpush3.bf16.msra.mxu1 %v1050_v12  ;;  %2211 = vmatpush3.bf16.msra.mxu0 %v1051_v13 }
 0x3f3   :  { %2216 = vmatprep.subr.bf16.mxu1 %v2430_v9  ;;  %2222 = vmatprep.subr.bf16.mxu0 %v2430_v9 }
 0x45c   :  { %v1296_v16 = vpop.xlane.xlu0 %1295 }
 0x45d   :  { %2324 = vrcp.f32 %v1296_v16 }
 0x460   :  { %v1302_v17 = vpop.xlane.xlu0 %1301  ;;  %v1299_v18 = vpop.xlane.xlu1 %1298 }
 0x461   :  { %2326 = vrcp.f32 %v1299_v18 }
 0x462   :  { %2328 = vrcp.f32 %v1302_v17 }
 0x464   :  { %v1305_v19 = vpop.xlane.xlu1 %1304 }
 0x465   :  { %2330 = vrcp.f32 %v1305_v19 }
 0x466   :  { %v1311_v25 = vpop.xlane.xlu0 %1310 }
 0x467   :  { %2332 = vrcp.f32 %v1311_v25  ;;  %v2325_v20 = vpop.eup %2324 }
 0x468   :  { %v1308_v27 = vpop.xlane.xlu1 %1307  ;;  %v1326_v53 = vmul.f32 %v2325_v20, %v2722_v26 }
 0x469   :  { %2334 = vrcp.f32 %v1308_v27 }
 0x46a   :  { %v1314_v21 = vpop.xlane.xlu0 %1313 }
 0x46b   :  { %2336 = vrcp.f32 %v1314_v21  ;;  %v2327_v22 = vpop.eup %2326 }
 0x46c   :  { %v1317_v23 = vpop.xlane.xlu1 %1316  ;;  %v2329_v24 = vpop.eup %2328  ;;  %v1327_v28 = vmul.f32 %v2327_v22, %v2728_v32 }
 0x46d   :  { %2338 = vrcp.f32 %v1317_v23  ;;  %v1328_v51 = vmul.f32 %v2329_v24, %v2726_v50 }
 0x46e   :  { %v1334_v30 = vpack.c.bf16 %v1327_v28, %v1326_v53 }
 0x46f   :  { %v2331_v29 = vpop.eup %2330 }
 0x470   :  { %v1329_v31 = vmul.f32 %v2331_v29, %v2734_v36  ;;  %2207 = vmatmul.mubr.msk.bf16.vlgmr.msra.gmra.mrb[8].mxu1 %vm1245_vm3, %v1334_v30 }
 0x471   :  { %v2333_v33 = vpop.eup %2332  ;;  %2217 = vmatpush3.bf16.msra.mxu1 %v1052_v14  ;;  %2218 = vmatprep.mubr.msk.bf16.mxu1 %vm2431_vm1, %v2430_v9 }
 0x472   :  { %v1335_v34 = vpack.c.bf16 %v1329_v31, %v1328_v51  ;;  %2228 = vmatprep.subr.bf16.mxu1 %v2430_v9  ;;  %v1331_v26 = vmul.f32 %v2333_v33, %v2740_v42 }
 0x473   :  { %v2335_v35 = vpop.eup %2334 }
 0x474   :  { %v1330_v32 = vmul.f32 %v2335_v35, %v2736_v38  ;;  %2213 = vmatmul.mubr.msk.bf16.vlgmr.msra.gmra.mrb[12].mxu0 %vm1245_vm3, %v1335_v34 }
 0x475   :  { %v2337_v50 = vpop.eup %2336  ;;  %2223 = vmatpush3.bf16.msra.mxu0 %v1053_v15  ;;  %2224 = vmatprep.mubr.msk.bf16.mxu0 %vm2431_vm1, %v2430_v9 }
 0x476   :  { %v1336_v36 = vpack.c.bf16 %v1331_v26, %v1330_v32  ;;  %2236 = vmatprep.subr.bf16.mxu0 %v2430_v9  ;;  %v1332_v39 = vmul.f32 %v2337_v50, %v2744_v47 }
 0x477   :  { %v2339_v37 = vpop.eup %2338 }
 0x478   :  { %v1333_v41 = vmul.f32 %v2339_v37, %v2748_v54  ;;  %2219 = vmatmul.mubr.msk.bf16.vlgmr.msra.gmra.mrb[12].mxu1 %vm1245_vm3, %v1336_v36 }
 0x479   :  { %2232 = vmatprep.mubr.msk.bf16.mxu1 %vm2431_vm1, %v2430_v9 }
 0x47a   :  { %v1337_v42 = vpack.c.bf16 %v1333_v41, %v1332_v39 }
 0x47c   :  { %2225 = vmatmul.mubr.msk.bf16.vlgmr.msra.gmra.mrb[16].mxu0 %vm1245_vm3, %v1337_v42  ;;  %v2296_v42 = vld [vmem:[#allocation3] sm:$0xff]  }
 0x47d   :  { %2240 = vmatprep.mubr.msk.bf16.mxu0 %vm2431_vm1, %v2430_v9  ;;  %2229 = vmatpush3.bf16.msra.mxu1 %v2296_v42 }
 0x47e   :  { %2230 = vmatprep.subr.bf16.mxu1 %v2430_v9 }
 0x543   :  { %v1375_v38 = vpop.f32.mrb[8].mxu1 }
 0x544   :  { %v2208_v43 = vpop.f32.mrb[9].mxu1 }
 0x545   :  { %v1378_v44 = vpop.f32.mrb[10].mxu1 }
 0x546   :  { %v2209_v45 = vpop.f32.mrb[11].mxu1 }
 0x547   :  { %v1419_v46 = vpop.f32.mrb[12].mxu0 }
 0x548   :  { %v2214_v48 = vpop.f32.mrb[13].mxu0 }
 0x549   :  { %v1422_v47 = vpop.f32.mrb[14].mxu0 }
 0x54a   :  { %v2215_v49 = vpop.f32.mrb[15].mxu0 }
 0x54b   :  { %v1463_v54 = vpop.f32.mrb[12].mxu1 }
 0x54c   :  { %v1514_v55 = vcombine.low %v1375_v38, %v1463_v54  ;;  %v1515_v56 = vcombine.high %v1375_v38, %v1463_v54  ;;  %v2220_v57 = vpop.f32.mrb[13].mxu1 }
 0x54d   :  { %v1466_v58 = vpop.f32.mrb[14].mxu1 }
 0x54e   :  { %v1582_v59 = vcombine.low %v1378_v44, %v1466_v58  ;;  %v1583_v60 = vcombine.high %v1378_v44, %v1466_v58  ;;  %v2221_v61 = vpop.f32.mrb[15].mxu1  ;;  %v1522_v2 = vrot.slane %v1514_v55, %v2570_v40  ;;  %v1529_v3 = vrot.slane %v1515_v56, %v2570_v40 }
 0x54f   :  { %v1507_v62 = vpop.f32.mrb[16].mxu0 }
 0x550   :  { %v1530_v63 = vcombine.low %v1419_v46, %v1507_v62  ;;  %v1531_v0 = vcombine.high %v1419_v46, %v1507_v62  ;;  %v2226_v1 = vpop.f32.mrb[17].mxu0  ;;  %v1590_v15 = vrot.slane %v1582_v59, %v2570_v40  ;;  %v1597_v16 = vrot.slane %v1583_v60, %v2570_v40  ;;  %v2297_v62 = vld [vmem:[#allocation3 + $0x8] sm:$0xff]  }
 0x551   :  { %v1510_v4 = vpop.f32.mrb[18].mxu0  ;;  %2231 = vmatpush3.bf16.msra.mxu1 %v2297_v62  ;;  %v2303_v62 = vld [vmem:[%s2912_s7 + $0x18] sm:$0xff]  }
 0x552   :  { %v1538_v5 = vrot.slane %v1530_v63, %v2570_v40  ;;  %v1545_v6 = vrot.slane %v1531_v0, %v2570_v40  ;;  %v1598_v7 = vcombine.low %v1422_v47, %v1510_v4  ;;  %v1599_v8 = vcombine.high %v1422_v47, %v1510_v4  ;;  %v2227_v10 = vpop.f32.mrb[19].mxu0  ;;  %2244 = vmatprep.subr.bf16.mxu1 %v2430_v9 }
 0x554   :  { %v1546_v11 = vcombine.low %v1522_v2, %v1538_v5  ;;  %v1547_v12 = vcombine.high %v1522_v2, %v1538_v5  ;;  %v1562_v13 = vcombine.low %v1529_v3, %v1545_v6  ;;  %v1563_v14 = vcombine.high %v1529_v3, %v1545_v6 }
 0x555   :  { %v1606_v17 = vrot.slane %v1598_v7, %v2570_v40  ;;  %v1613_v18 = vrot.slane %v1599_v8, %v2570_v40 }
 0x556   :  { %v1554_v19 = vrot.slane %v1546_v11, %v2576_v52  ;;  %v1561_v25 = vrot.slane %v1547_v12, %v2576_v52  ;;  %v1570_v27 = vrot.slane %v1562_v13, %v2576_v52  ;;  %v1577_v20 = vrot.slane %v1563_v14, %v2576_v52 }
 0x557   :  { %v1614_v21 = vcombine.low %v1590_v15, %v1606_v17  ;;  %v1615_v22 = vcombine.high %v1590_v15, %v1606_v17  ;;  %v1630_v23 = vcombine.low %v1597_v16, %v1613_v18  ;;  %v1631_v24 = vcombine.high %v1597_v16, %v1613_v18 }
 0x558   :  { %v1650_v53 = vcombine.low %v1554_v19, %v1561_v25  ;;  %v2124_v28 = vcombine.high %v1554_v19, %v1561_v25  ;;  %v1666_v29 = vcombine.low %v1570_v27, %v1577_v20  ;;  %v2125_v30 = vcombine.high %v1570_v27, %v1577_v20 }
 0x559   :  { %v1622_v51 = vrot.slane %v1614_v21, %v2576_v52  ;;  %v1629_v31 = vrot.slane %v1615_v22, %v2576_v52  ;;  %v1638_v33 = vrot.slane %v1630_v23, %v2576_v52  ;;  %v1645_v34 = vrot.slane %v1631_v24, %v2576_v52 }
 0x55a   :  { %v1657_v35 = vrot.slane %v1650_v53, %v2570_v40  ;;  %v1665_v26 = vrot.slane %v2124_v28, %v2570_v40  ;;  %v1673_v32 = vrot.slane %v1666_v29, %v2570_v40  ;;  %v1681_v50 = vrot.slane %v2125_v30, %v2570_v40  ;;  %v2352_v30 = vld [vmem:[#allocation2] sm:$0xff] }
 0x55b   :  { %v1718_v36 = vcombine.low %v1622_v51, %v1629_v31  ;;  %v2126_v37 = vcombine.high %v1622_v51, %v1629_v31  ;;  %v1734_v39 = vcombine.low %v1638_v33, %v1645_v34  ;;  %v2127_v41 = vcombine.high %v1638_v33, %v1645_v34  ;;  %v2353_v34 = vld [vmem:[#allocation2 + $0x8] sm:$0xff] }
 0x55c   :  { %v1683_v38 = vcombine.high %v1657_v35, %v1665_v26  ;;  %v1699_v43 = vcombine.high %v1673_v32, %v1681_v50  ;;  %v1682_v44 = vcombine.low %v1657_v35, %v1665_v26  ;;  %v1698_v45 = vcombine.low %v1673_v32, %v1681_v50 }
 0x55d   :  { %v1725_v46 = vrot.slane %v1718_v36, %v2570_v40  ;;  %v1733_v48 = vrot.slane %v2126_v37, %v2570_v40  ;;  %v1741_v47 = vrot.slane %v1734_v39, %v2570_v40  ;;  %v1749_v49 = vrot.slane %v2127_v41, %v2570_v40  ;;  %v2298_v39 = vld [vmem:[#allocation6] sm:$0xff]   ;;  %v2299_v41 = vld [vmem:[#allocation6 + $0x8] sm:$0xff]  }
 0x55e   :  { %v1697_v54 = vrot.slane %v1683_v38, %v2576_v52  ;;  %v1713_v55 = vrot.slane %v1699_v43, %v2576_v52  ;;  %v1690_v56 = vrot.slane %v1682_v44, %v2576_v52  ;;  %v1706_v57 = vrot.slane %v1698_v45, %v2576_v52  ;;  %2237 = vmatpush3.bf16.msra.mxu0 %v2298_v39 }
 0x55f   :  { %v1751_v58 = vcombine.high %v1725_v46, %v1733_v48  ;;  %v1767_v59 = vcombine.high %v1741_v47, %v1749_v49  ;;  %v1750_v60 = vcombine.low %v1725_v46, %v1733_v48  ;;  %v1766_v61 = vcombine.low %v1741_v47, %v1749_v49  ;;  %2238 = vmatprep.subr.bf16.mxu0 %v2430_v9 }
 0x560   :  { %v1716_v63 = vcombine.low %v1697_v54, %v1713_v55  ;;  %v1714_v0 = vcombine.low %v1690_v56, %v1706_v57  ;;  %v1715_v1 = vcombine.high %v1690_v56, %v1706_v57  ;;  %v1717_v40 = vcombine.high %v1697_v54, %v1713_v55  ;;  %v2131_v54 = vld [vmem:[%s2910_s5] ss:$0 sm:$0xff] }
 0x561   :  { %v1765_v2 = vrot.slane %v1751_v58, %v2576_v52  ;;  %v1781_v3 = vrot.slane %v1767_v59, %v2576_v52  ;;  %v1758_v4 = vrot.slane %v1750_v60, %v2576_v52  ;;  %v1774_v5 = vrot.slane %v1766_v61, %v2576_v52  ;;  %v2300_v59 = vld [vmem:[%s2912_s7] sm:$0xff]   ;;  %v2301_v60 = vld [vmem:[%s2912_s7 + $0x8] sm:$0xff]   ;;  %v2302_v61 = vld [vmem:[%s2912_s7 + $0x10] sm:$0xff]   ;;  %s2447_s7 = smov [#allocation8]  }
 0x562   :  { %2239 = vmatpush3.bf16.msra.mxu0 %v2299_v41 }
 0x563   :  { %v1784_v6 = vcombine.low %v1765_v2, %v1781_v3  ;;  %v1783_v7 = vcombine.high %v1758_v4, %v1774_v5  ;;  %v1782_v8 = vcombine.low %v1758_v4, %v1774_v5  ;;  %v1785_v10 = vcombine.high %v1765_v2, %v1781_v3 }
 0x565   :  { %v2284_v11 = vpack.i.bf16 %v1784_v6, %v1716_v63  ;;  %v2279_v12 = vpack.i.bf16 %v1783_v7, %v1715_v1  ;;  %v2289_v13 = vpack.i.bf16 %v1785_v10, %v1717_v40 }
 0x567   :  { %2285 = vrot.lane.b32.xlu1 %v2284_v11, %s2444_s29  ;;  %2280 = vrot.lane.b32.xlu0 %v2279_v12, %s2445_s4 }
 0x56b   :  { %2290 = vrot.lane.b32.xlu1 %v2289_v13, %s2446_s28 }
 0x5d9   :  { %v2286_v14 = vpop.permute.xlu1 %2285  ;;  %v2281_v15 = vpop.permute.xlu0 %2280 }
 0x5da   :  { %v2283_v52 = vunpack.i.h.bf16 %v2281_v15  ;;  %v2282_v16 = vunpack.i.l.bf16 %v2281_v15  ;;  %v2288_v17 = vunpack.i.h.bf16 %v2286_v14  ;;  %v2287_v18 = vunpack.i.l.bf16 %v2286_v14 }
 0x5dc   :  { %v1810_v19 = vsel %vm1056_vm2, %v1714_v0, %v2282_v16  ;;  %v1811_v25 = vsel %vm1056_vm2, %v1782_v8, %v2283_v52 }
 0x5dd   :  { %v2291_v27 = vpop.permute.xlu1 %2290  ;;  %v1812_v22 = vsel %vm1245_vm3, %v1810_v19, %v2287_v18  ;;  %v1813_v23 = vsel %vm1245_vm3, %v1811_v25, %v2288_v17 }
 0x5de   :  { %v2293_v20 = vunpack.i.h.bf16 %v2291_v27  ;;  %v2292_v21 = vunpack.i.l.bf16 %v2291_v27 }
 0x5e0   :  { %v1815_v24 = vsel %vm1814_vm4, %v1812_v22, %v2292_v21  ;;  %v1816_v53 = vsel %vm1814_vm4, %v1813_v23, %v2293_v20 }
 0x5e1   :  { %v1817_v28 = vpack.c.bf16 %v1816_v53, %v1815_v24 }
 0x5e3   :  { %2233 = vmatmul.mubr.msk.bf16.vlgmr.msra.gmra.mrb[16].mxu1 %vm65_vm0, %v1817_v28 }
 0x5e4   :  { %2252 = vmatprep.mubr.msk.bf16.mxu1 %vm2431_vm1, %v2430_v9  ;;  %2245 = vmatpush3.bf16.msra.mxu1 %v2300_v59 }
 0x5e5   :  { %2246 = vmatprep.subr.bf16.mxu1 %v2430_v9 }
 0x5e8   :  { %2247 = vmatpush3.bf16.msra.mxu1 %v2301_v60 }
 0x5e9   :  { %2248 = vmatprep.subr.bf16.mxu1 %v2430_v9 }
 0x5ec   :  { %2249 = vmatpush3.bf16.msra.mxu1 %v2302_v61 }
 0x5ed   :  { %2250 = vmatprep.subr.bf16.mxu1 %v2430_v9 }
 0x5f0   :  { %2251 = vmatpush3.bf16.msra.mxu1 %v2303_v62 }
 0x6b6   :  { %v1871_v29 = vpop.f32.mrb[16].mxu1 }
 0x6b7   :  { %v2852_v51 = vadd.f32 %v2352_v30, %v1871_v29  ;;  %v2234_v31 = vpop.f32.mrb[17].mxu1 }
 0x6b8   :  { %v1874_v33 = vpop.f32.mrb[18].mxu1 }
 0x6b9   :  { %v2854_v35 = vadd.f32 %v2353_v34, %v1874_v33  ;;  %v2235_v26 = vpop.f32.mrb[19].mxu1  ;;  %v1881_v32 = vmul.f32 %v2852_v51, %v2852_v51 }
 0x6bb   :  { %v1883_v50 = vsel %vm65_vm0, %v1881_v32, 0.0  ;;  %v1882_v36 = vmul.f32 %v2854_v35, %v2854_v35 }
 0x6bc   :  { %1884 = vadd.xlane.f32.xlu0 %v1883_v50 }
 0x6bd   :  { %v1886_v37 = vsel %vm65_vm0, %v1882_v36, 0.0 }
 0x6be   :  { %1887 = vadd.xlane.f32.xlu1 %v1886_v37 }
 0x749   :  { %v1885_v42 = vpop.xlane.xlu0 %1884 }
 0x74a   :  { %v1889_v38 = vmul.f32 0.03125, %v1885_v42 }
 0x74b   :  { %v1888_v43 = vpop.xlane.xlu1 %1887 }
 0x74c   :  { %v1891_v44 = vadd.f32 1e-06, %v1889_v38  ;;  %v1890_v45 = vmul.f32 0.03125, %v1888_v43 }
 0x74e   :  { %2340 = vrsqrt.f32 %v1891_v44  ;;  %v1892_v46 = vadd.f32 1e-06, %v1890_v45 }
 0x750   :  { %2342 = vrsqrt.f32 %v1892_v46 }
 0x758   :  { %v2341_v48 = vpop.eup %2340 }
 0x759   :  { %v1895_v47 = vmul.f32 %v2341_v48, %v2852_v51 }
 0x75a   :  { %v2343_v49 = vpop.eup %2342 }
 0x75b   :  { %v1896_v55 = vmul.f32 %v2343_v49, %v2854_v35  ;;  %v1903_v56 = vmul.f32 %v2131_v54, %v1895_v47 }
 0x75d   :  { %v1904_v57 = vmul.f32 %v2131_v54, %v1896_v55 }
 0x75f   :  { %v1905_v58 = vpack.c.bf16 %v1904_v57, %v1903_v56 }
 0x761   :  { %2241 = vmatmul.mubr.msk.bf16.vlgmr.msra.gmra.mrb[20].mxu0 %vm65_vm0, %v1905_v58 }
 0x834   :  { %v1959_v63 = vpop.f32.mrb[20].mxu0 }
 0x835   :  { %1982 = vrot.lane.b32.xlu0 %v1959_v63, %s2427_s15  ;;  %v2242_v0 = vpop.f32.mrb[21].mxu0  ;;  %v2135_v2 = vmul.f32 -1.442695, %v1959_v63 }
 0x836   :  { %v1962_v1 = vpop.f32.mrb[22].mxu0 }
 0x837   :  { %1984 = vrot.lane.b32.xlu1 %v1962_v1, %s2427_s15  ;;  %v2243_v40 = vpop.f32.mrb[23].mxu0  ;;  %v2136_v3 = vmul.f32 -1.442695, %v1962_v1  ;;  %2344 = vpow2.f32 %v2135_v2  ;;  %s2079_s15 = sshll.u32 %s2447_s7, 4  ;;  %s2080_s15 = int_to_ptr.vmem [resolvable:$true] %s2079_s15 }
 0x838   :  { %s2398_s14 = scalar_lea.vmem %s2080_s15, 256  ;;  %p2403_p3 = scmp.lt.s32.totalorder %s2080_s15, %s2080_s15 }
 0x839   :  { %2346 = vpow2.f32 %v2136_v3  ;;  %p2399_p2 = scmp.ne.s32.totalorder %s2080_s15, %s2398_s14  ;;  %p2404_p4 = scmp.lt.s32.totalorder %s2398_s14, %s2398_s14 }
 0x83b   :  { %p2405_p5 = por %p2404_p4, %p2403_p3 }
 0x83d   :  { %p2406_p6 = pnand %p2405_p5, %p2399_p2 }
 0x841   :  { %v2345_v4 = vpop.eup %2344 }
 0x842   :  { %v1972_v9 = vadd.f32 1.0, %v2345_v4 }
 0x843   :  { %v2347_v5 = vpop.eup %2346 }
 0x844   :  { %v1973_v6 = vadd.f32 1.0, %v2347_v5  ;;  %2348 = vrcp.f32 %v1972_v9 }
 0x846   :  { %2350 = vrcp.f32 %v1973_v6 }
 0x84e   :  { %v2349_v7 = vpop.eup %2348 }
 0x84f   :  { %v1978_v11 = vmul.f32 %v2349_v7, %v1959_v63 }
 0x850   :  { %v2351_v8 = vpop.eup %2350 }
 0x851   :  { %v1979_v12 = vmul.f32 %v2351_v8, %v1962_v1 }
 0x8a7   :  { %v1983_v10 = vpop.permute.xlu0 %1982 }
 0x8a8   :  { %v1988_v14 = vmul.f32 %v1983_v10, %v1978_v11 }
 0x8a9   :  { %v1985_v13 = vpop.permute.xlu1 %1984 }
 0x8aa   :  { %v1989_v15 = vmul.f32 %v1985_v13, %v1979_v12 }
 0x8ac   :  { %v1990_v52 = vpack.c.bf16 %v1989_v15, %v1988_v14 }
 0x8ae   :  { %2253 = vmatmul.mubr.msk.bf16.vlgmr.msra.gmra.mrb[20].mxu1 %vm2023_vm5, %v1990_v52 }
 0x981   :  { %v2061_v16 = vpop.f32.mrb[20].mxu1 }
 0x982   :  { %v2068_v17 = vadd.f32 %v2061_v16, %v2852_v51  ;;  %v2254_v18 = vpop.f32.mrb[21].mxu1 }
 0x983   :  { %v2064_v19 = vpop.f32.mrb[22].mxu1 }
 0x984   :  { %2070 = vst.msk [vmem:[#allocation2] sm:$0xff] %vm65_vm0, %v2068_v17  ;;  %2072 = vst.msk [vmem:[#allocation8] sm:$0xff] %vm65_vm0, %v2068_v17  ;;  %v2069_v25 = vadd.f32 %v2064_v19, %v2854_v35  ;;  %v2255_v27 = vpop.f32.mrb[23].mxu1 }
 0x986   :  { %2071 = vst.msk [vmem:[#allocation2 + $0x8] sm:$0xff] %vm65_vm0, %v2069_v25  ;;  %2073 = vst.msk [vmem:[#allocation8 + $0x8] sm:$0xff] %vm65_vm0, %v2069_v25 }
 0x987   :  { %2409 = shalt.err (!%p2406_p6)
}
 0x988   :  { %s2410_s2 = scalar_lea.hbm %s2913_s8, 256 }
 0x989   :  { %p2411_p7 = scmp.ne.s32.totalorder %s2913_s8, %s2410_s2  ;;  %p2414_p8 = scmp.lt.u32.totalorder %s2410_s2, %s2913_s8 }
 0x98b   :  { %p2416_p9 = pnand %p2414_p8, %p2411_p7 }
 0x98d   :  { %2419 = shalt.err (!%p2416_p9)
}
 0x98e   :  { %s2448_s22 = smov 128  }
 0x98f   :  { %2085 = dma.vmem_to_hbm [thread:$0]  %s2080_s15, 256, %s2913_s8, [#allocation5], %s2448_s22, %s2448_s22, %s2445_s4  }
 0x990   :  { %2424 = dma.done.wait [#allocation5], 256  }
 0x991   :  { %2425 = vsyncadd [#allocation5], 4294967040 }
 0x992   :  { %2089 = vsyncpa [#allocation4], 1 }
 0x993   :  { %2090 = vsyncpa [#allocation7], 1 }
 0x994   :  { %2091 = vsyncpa [#allocation5], 1 }

</bundles_post_ra>
